<compile_context>
chip_gen: v7x
topology: tpu7x:2x2x1
jax: 0.10.0
libtpu: 0.0.40
codegen_flags: <defaults>
</compile_context>

<pallas_src>
import functools
import math

import numpy as np

import jax
import jax.numpy as jnp
from jax import lax
from jax.experimental import pallas as pl
from jax.experimental.pallas import tpu as pltpu


_VMEM_LIMIT = 64 * 1024 * 1024  # fits v7x (64 MiB) and v5e/v6e (128 MiB)


# ------------------------------- small helpers ------------------------------

def _round_up(x, m):
    return (x + m - 1) // m * m


def _pick_div(n, target):
    """Largest divisor of n that is <= target."""
    t = min(n, target)
    while n % t:
        t -= 1
    return t


def _pad_channels(x, c_to):
    c = x.shape[-1]
    if c == c_to:
        return x
    widths = [(0, 0)] * (x.ndim - 1) + [(0, c_to - c)]
    return jnp.pad(x, widths)


_MMAT_CACHE = {}


def _membership(C, groups):
    """Hoisted (C, C) group-membership matrix (built once per (C, groups))."""
    key = (C, groups)
    if key not in _MMAT_CACHE:
        g = np.arange(C) // (C // groups)
        _MMAT_CACHE[key] = jnp.asarray((g[:, None] == g[None, :]),
                                       dtype=jnp.float32)
    return _MMAT_CACHE[key]


# ----------------------------- Pallas kernels ------------------------------

def _matmul_kernel(x_ref, w_ref, b_ref, o_ref, acc_ref):
    # tiled GEMM: x (tm, tk) bf16, w (tk, tn) bf16, b (1, tn) f32
    @pl.when(pl.program_id(2) == 0)
    def _():
        acc_ref[...] = jnp.zeros_like(acc_ref)

    acc_ref[...] += jnp.dot(x_ref[...], w_ref[...],
                            preferred_element_type=jnp.float32)

    @pl.when(pl.program_id(2) == pl.num_programs(2) - 1)
    def _():
        o_ref[...] = (acc_ref[...] + b_ref[...]).astype(o_ref.dtype)


def _matmul_res_kernel(x_ref, w_ref, b_ref, r_ref, o_ref, acc_ref):
    # same as above with the residual/skip add fused into the writeback
    @pl.when(pl.program_id(2) == 0)
    def _():
        acc_ref[...] = jnp.zeros_like(acc_ref)

    acc_ref[...] += jnp.dot(x_ref[...], w_ref[...],
                            preferred_element_type=jnp.float32)

    @pl.when(pl.program_id(2) == pl.num_programs(2) - 1)
    def _():
        o_ref[...] = (acc_ref[...] + b_ref[...]
                      + r_ref[...].astype(jnp.float32)).astype(o_ref.dtype)


def _conv3_kernel(x_ref, w_ref, b_ref, o_ref, *, th, w_cols):
    # x: (1, (th+2)*W, 3*Cin)  -- W-pre-shifted, row-halo'd tile
    # w: (3, 3*Cin, tco)       -- one (3*Cin, tco) matrix per row tap
    acc = jnp.zeros((th * w_cols, o_ref.shape[-1]), jnp.float32)
    for kh in range(3):
        acc = acc + jnp.dot(x_ref[0, kh * w_cols:(kh + th) * w_cols, :],
                            w_ref[kh], preferred_element_type=jnp.float32)
    o_ref[0] = (acc + b_ref[...]).astype(o_ref.dtype)


def _conv3_res_kernel(x_ref, w_ref, b_ref, r_ref, o_ref, *, th, w_cols):
    acc = jnp.zeros((th * w_cols, o_ref.shape[-1]), jnp.float32)
    for kh in range(3):
        acc = acc + jnp.dot(x_ref[0, kh * w_cols:(kh + th) * w_cols, :],
                            w_ref[kh], preferred_element_type=jnp.float32)
    o_ref[0] = (acc + b_ref[...]
                + r_ref[0].astype(jnp.float32)).astype(o_ref.dtype)


def _gn_stats_kernel(x_ref, m_ref, mean_ref, rstd_ref, acc_ref, *,
                     inv_count, eps):
    # pass 1: accumulate per-channel sum / sum(x^2) over HW tiles, then pool
    # per group via the hoisted membership matmul and emit mean / rstd.
    @pl.when(pl.program_id(1) == 0)
    def _():
        acc_ref[...] = jnp.zeros_like(acc_ref)

    x = x_ref[0].astype(jnp.float32)
    acc_ref[0:1, :] += jnp.sum(x, axis=0, keepdims=True)
    acc_ref[1:2, :] += jnp.sum(x * x, axis=0, keepdims=True)

    @pl.when(pl.program_id(1) == pl.num_programs(1) - 1)
    def _():
        mean = jnp.dot(acc_ref[0:1, :], m_ref[...],
                       preferred_element_type=jnp.float32) * inv_count
        ex2 = jnp.dot(acc_ref[1:2, :], m_ref[...],
                      preferred_element_type=jnp.float32) * inv_count
        var = jnp.maximum(ex2 - mean * mean, 0.0)
        mean_ref[0] = mean
        rstd_ref[0] = lax.rsqrt(var + eps)


def _gn_apply_kernel(x_ref, mean_ref, rstd_ref, g_ref, b_ref, o_ref, *,
                     apply_swish):
    # pass 2: normalize one HW tile (+ optional fused Swish), all math in f32
    x = x_ref[0].astype(jnp.float32)
    y = (x - mean_ref[0]) * rstd_ref[0] * g_ref[...] + b_ref[...]
    if apply_swish:
        y = y * jax.nn.sigmoid(y)
    o_ref[0] = y.astype(o_ref.dtype)


def _attention_kernel(q_ref, k_ref, v_ref, o_ref, *, scale):
    # q/k/v: (1, HW, C) bf16.  Scale folded into q, contraction over C done
    # in-kernel (no host-side K transpose), softmax in f32, EUP reciprocal.
    q = (q_ref[...].astype(jnp.float32) * scale).astype(jnp.bfloat16)
    s = jnp.einsum("bqd,bkd->bqk", q, k_ref[...],
                   preferred_element_type=jnp.float32)
    s = s - jnp.max(s, axis=-1, keepdims=True)
    p = jnp.exp(s)
    denom = jnp.sum(p, axis=-1, keepdims=True)
    pv = jnp.einsum("bqk,bkd->bqd", p.astype(jnp.bfloat16), v_ref[...],
                    preferred_element_type=jnp.float32)
    o_ref[...] = (pv * pl.reciprocal(denom, approx=True)).astype(o_ref.dtype)


# ------------------ cached, jitted pallas_call constructors -----------------

@functools.lru_cache(maxsize=None)
def _matmul_call(Mp, Kp, Cop, tm, tn, tk, with_res):
    grid = (Mp // tm, Cop // tn, Kp // tk)
    in_specs = [pl.BlockSpec((tm, tk), lambda i, j, k: (i, k)),
                pl.BlockSpec((tk, tn), lambda i, j, k: (k, j)),
                pl.BlockSpec((1, tn), lambda i, j, k: (0, j))]
    kern = _matmul_kernel
    if with_res:
        in_specs.append(pl.BlockSpec((tm, tn), lambda i, j, k: (i, j)))
        kern = _matmul_res_kernel
    return jax.jit(pl.pallas_call(
        kern, grid=grid, in_specs=in_specs,
        out_specs=pl.BlockSpec((tm, tn), lambda i, j, k: (i, j)),
        out_shape=jax.ShapeDtypeStruct((Mp, Cop), jnp.bfloat16),
        scratch_shapes=[pltpu.VMEM((tm, tn), jnp.float32)],
        compiler_params=pltpu.CompilerParams(
            dimension_semantics=("parallel", "parallel", "arbitrary"),
            vmem_limit_bytes=_VMEM_LIMIT)))


@functools.lru_cache(maxsize=None)
def _conv3_call(T, th, W, K, Cop, tco, with_res):
    grid = (T, Cop // tco)
    kern = functools.partial(
        _conv3_res_kernel if with_res else _conv3_kernel, th=th, w_cols=W)
    in_specs = [pl.BlockSpec((1, (th + 2) * W, K), lambda i, j: (i, 0, 0)),
                pl.BlockSpec((3, K, tco), lambda i, j: (0, 0, j)),
                pl.BlockSpec((1, tco), lambda i, j: (0, j))]
    if with_res:
        in_specs.append(pl.BlockSpec((1, th * W, tco), lambda i, j: (i, 0, j)))
    return jax.jit(pl.pallas_call(
        kern, grid=grid, in_specs=in_specs,
        out_specs=pl.BlockSpec((1, th * W, tco), lambda i, j: (i, 0, j)),
        out_shape=jax.ShapeDtypeStruct((T, th * W, Cop), jnp.bfloat16),
        compiler_params=pltpu.CompilerParams(
            dimension_semantics=("parallel", "parallel"),
            vmem_limit_bytes=_VMEM_LIMIT)))


@functools.lru_cache(maxsize=None)
def _gn_stats_call(N, nt, thw, C, inv_count, eps):
    kern = functools.partial(_gn_stats_kernel, inv_count=inv_count, eps=eps)
    return jax.jit(pl.pallas_call(
        kern, grid=(N, nt),
        in_specs=[pl.BlockSpec((1, thw, C), lambda n, t: (n, t, 0)),
                  pl.BlockSpec((C, C), lambda n, t: (0, 0))],
        out_specs=[pl.BlockSpec((1, 1, C), lambda n, t: (n, 0, 0)),
                   pl.BlockSpec((1, 1, C), lambda n, t: (n, 0, 0))],
        out_shape=(jax.ShapeDtypeStruct((N, 1, C), jnp.float32),
                   jax.ShapeDtypeStruct((N, 1, C), jnp.float32)),
        scratch_shapes=[pltpu.VMEM((2, C), jnp.float32)],
        compiler_params=pltpu.CompilerParams(
            dimension_semantics=("parallel", "arbitrary"))))


@functools.lru_cache(maxsize=None)
def _gn_apply_call(N, nt, thw, HW, C, apply_swish):
    kern = functools.partial(_gn_apply_kernel, apply_swish=apply_swish)
    return jax.jit(pl.pallas_call(
        kern, grid=(N, nt),
        in_specs=[pl.BlockSpec((1, thw, C), lambda n, t: (n, t, 0)),
                  pl.BlockSpec((1, 1, C), lambda n, t: (n, 0, 0)),
                  pl.BlockSpec((1, 1, C), lambda n, t: (n, 0, 0)),
                  pl.BlockSpec((1, C), lambda n, t: (0, 0)),
                  pl.BlockSpec((1, C), lambda n, t: (0, 0))],
        out_specs=pl.BlockSpec((1, thw, C), lambda n, t: (n, t, 0)),
        out_shape=jax.ShapeDtypeStruct((N, HW, C), jnp.bfloat16),
        compiler_params=pltpu.CompilerParams(
            dimension_semantics=("parallel", "parallel"))))


@functools.lru_cache(maxsize=None)
def _attn_call(N, HW, C, scale):
    kern = functools.partial(_attention_kernel, scale=scale)
    return jax.jit(pl.pallas_call(
        kern, grid=(N,),
        in_specs=[pl.BlockSpec((1, HW, C), lambda i: (i, 0, 0)),
                  pl.BlockSpec((1, HW, C), lambda i: (i, 0, 0)),
                  pl.BlockSpec((1, HW, C), lambda i: (i, 0, 0))],
        out_specs=pl.BlockSpec((1, HW, C), lambda i: (i, 0, 0)),
        out_shape=jax.ShapeDtypeStruct((N, HW, C), jnp.bfloat16),
        compiler_params=pltpu.CompilerParams(
            dimension_semantics=("parallel",))))


# ------------------------------ op wrappers ---------------------------------

def matmul_bias(x, w, b, residual=None):
    """x: (M, K), w: (K, Co), b: (Co,) -> (M, Co) bf16; bias(+residual) fused."""
    M, K = x.shape
    Co = w.shape[1]
    Kp, Cop = _round_up(K, 128), _round_up(Co, 128)
    tk = 256 if Kp % 256 == 0 else 128
    tn = 256 if Cop % 256 == 0 else 128
    if M >= 2048:
        tm = 512
    elif M >= 512:
        tm = 256
    elif M >= 128:
        tm = 128
    else:
        tm = _round_up(M, 8)
    Mp = _round_up(M, tm)

    xq = jnp.pad(x.astype(jnp.bfloat16), ((0, Mp - M), (0, Kp - K)))
    wq = jnp.pad(w.astype(jnp.bfloat16), ((0, Kp - K), (0, Cop - Co)))
    bq = jnp.pad(b.astype(jnp.float32), (0, Cop - Co)).reshape(1, Cop)
    args = [xq, wq, bq]
    if residual is not None:
        args.append(jnp.pad(residual.astype(jnp.bfloat16),
                            ((0, Mp - M), (0, Cop - Co))))
    out = _matmul_call(Mp, Kp, Cop, tm, tn, tk, residual is not None)(*args)
    return out[:M, :Co]


def conv1x1(x, w, b, residual=None):
    N, H, W, Cin = x.shape
    Cout = w.shape[-1]
    x2 = x.reshape(N * H * W, Cin)
    r2 = None if residual is None else residual.reshape(N * H * W, Cout)
    out = matmul_bias(x2, w.reshape(Cin, Cout), b, residual=r2)
    return out.reshape(N, H, W, Cout)


def conv3x3_s1(x, w, b, residual=None, row_tile=8):
    """3x3 stride-1 conv, pad 1.  Row-halo tiles, in-kernel row-tap sum."""
    N, H, W, Cin = x.shape
    Cout = w.shape[-1]
    Cinp = _round_up(Cin, 128)
    Coutp = _round_up(Cout, 128)
    K = 3 * Cinp

    xb = _pad_channels(x.astype(jnp.bfloat16), Cinp)
    xp = jnp.pad(xb, ((0, 0), (1, 1), (1, 1), (0, 0)))        # 1px spatial halo
    # Pre-shift along W only (3x duplication instead of 9x im2col); the 3 row
    # taps are accumulated inside the kernel from a halo'd row tile.
    xw = jnp.concatenate([xp[:, :, kw:kw + W, :] for kw in range(3)], axis=-1)

    th = _pick_div(H, row_tile)
    nh = H // th
    xt = jnp.stack([xw[:, i * th:i * th + th + 2] for i in range(nh)], axis=1)
    xt = xt.reshape(N * nh, (th + 2) * W, K)

    wp = jnp.pad(w, ((0, 0), (0, 0), (0, Cinp - Cin), (0, Coutp - Cout)))
    wt = wp.reshape(3, K, Coutp).astype(jnp.bfloat16)
    bt = jnp.pad(b.astype(jnp.float32), (0, Coutp - Cout)).reshape(1, Coutp)

    tco = 256 if Coutp % 256 == 0 else 128
    args = [xt, wt, bt]
    if residual is not None:
        args.append(_pad_channels(residual.astype(jnp.bfloat16), Coutp)
                    .reshape(N * nh, th * W, Coutp))
    out = _conv3_call(N * nh, th, W, K, Coutp, tco, residual is not None)(*args)
    out = out.reshape(N, nh, th, W, Coutp).reshape(N, H, W, Coutp)
    return out[..., :Cout]


def downsample(x, w, b):
    """F.pad(x, (0,1,0,1)) then 3x3 conv stride 2, pad 0."""
    N, H, W, Cin = x.shape
    Cout = w.shape[-1]
    Ho, Wo = H // 2, W // 2
    xp = jnp.pad(x.astype(jnp.bfloat16), ((0, 0), (0, 1), (0, 1), (0, 0)))
    # TODO(synk): replace this stride-2 im2col with an in-kernel even/odd
    # phase-split conv like the stride-1 path (only 4 such layers exist).
    patches = [xp[:, kh:kh + 2 * Ho:2, kw:kw + 2 * Wo:2, :]
               for kh in range(3) for kw in range(3)]
    cols = jnp.concatenate(patches, axis=-1).reshape(N * Ho * Wo, 9 * Cin)
    out = matmul_bias(cols, w.reshape(9 * Cin, Cout), b)
    return out.reshape(N, Ho, Wo, Cout)


def pallas_groupnorm(x, gamma, beta, num_groups, apply_swish, eps=1e-6):
    """Two-pass, HW-tiled GroupNorm (PyTorch semantics) + optional Swish."""
    N, H, W, C = x.shape
    HW = H * W
    cg = C // num_groups
    thw = _pick_div(HW, 1024)
    nt = HW // thw
    xf = x.astype(jnp.bfloat16).reshape(N, HW, C)
    mmat = _membership(C, num_groups)

    mean, rstd = _gn_stats_call(N, nt, thw, C, 1.0 / float(HW * cg),
                                float(eps))(xf, mmat)
    out = _gn_apply_call(N, nt, thw, HW, C, bool(apply_swish))(
        xf, mean, rstd,
        gamma.astype(jnp.float32).reshape(1, C),
        beta.astype(jnp.float32).reshape(1, C))
    return out.reshape(N, H, W, C)


def pallas_attention(q, k, v, scale):
    N, HW, C = q.shape
    return _attn_call(N, HW, C, float(scale))(q, k, v)


# ------------------------- parameter initialization -------------------------

def _init_conv(key, kh, kw, cin, cout):
    std = 1.0 / math.sqrt(kh * kw * cin)
    w = jax.random.normal(key, (kh, kw, cin, cout), jnp.float32) * std
    b = jnp.zeros((cout,), jnp.float32)
    return {"w": w, "b": b}


def _init_gn(c):
    return {"gamma": jnp.ones((c,), jnp.float32),
            "beta": jnp.zeros((c,), jnp.float32)}


def _init_residual(keys, cin, cout):
    p = {"cin": cin, "cout": cout,
         "gn1": _init_gn(cin), "conv1": _init_conv(next(keys), 3, 3, cin, cout),
         "gn2": _init_gn(cout), "conv2": _init_conv(next(keys), 3, 3, cout, cout)}
    if cin != cout:
        p["channel_up"] = _init_conv(next(keys), 1, 1, cin, cout)
    return p


def _init_nonlocal(keys, c):
    return {"c": c, "gn": _init_gn(c),
            "q": _init_conv(next(keys), 1, 1, c, c),
            "k": _init_conv(next(keys), 1, 1, c, c),
            "v": _init_conv(next(keys), 1, 1, c, c),
            "proj": _init_conv(next(keys), 1, 1, c, c)}


def build_encoder_params(key, image_channels, latent_dim, channels,
                         resolution=256, attn_resolutions=(16,),
                         res_block_cnt=2):
    """Mirrors Encoder.__init__ layer construction exactly (tail GN+Swish fused)."""
    keys = iter(jax.random.split(key, 512))
    layers = [("conv3x3", _init_conv(next(keys), 3, 3, image_channels, channels[0]))]
    for layer in range(len(channels) - 1):
        in_c = channels[layer]
        out_c = channels[layer + 1]
        for _ in range(res_block_cnt):
            layers.append(("residual", _init_residual(keys, in_c, out_c)))
            in_c = out_c
            if resolution in attn_resolutions:
                layers.append(("nonlocal", _init_nonlocal(keys, in_c)))
        if layer != len(channels) - 2:
            layers.append(("downsample",
                           _init_conv(next(keys), 3, 3, channels[layer + 1],
                                      channels[layer + 1])))
            resolution //= 2
    layers.append(("residual", _init_residual(keys, channels[-1], channels[-1])))
    layers.append(("nonlocal", _init_nonlocal(keys, channels[-1])))
    layers.append(("residual", _init_residual(keys, channels[-1], channels[-1])))
    # GroupNorm + Swish fused into one layer (identical math, one less pass).
    layers.append(("groupnorm_swish", _init_gn(channels[-1])))
    layers.append(("conv3x3", _init_conv(next(keys), 3, 3, channels[-1], latent_dim)))
    return layers


# ------------------------------- forward pass -------------------------------

def _residual_block(x, p, num_groups):
    h = pallas_groupnorm(x, p["gn1"]["gamma"], p["gn1"]["beta"], num_groups,
                         apply_swish=True)
    h = conv3x3_s1(h, p["conv1"]["w"], p["conv1"]["b"])
    h = pallas_groupnorm(h, p["gn2"]["gamma"], p["gn2"]["beta"], num_groups,
                         apply_swish=True)
    if p["cin"] != p["cout"]:
        skip = conv1x1(x, p["channel_up"]["w"], p["channel_up"]["b"])
    else:
        skip = x
    # skip connection fused into the final conv kernel
    return conv3x3_s1(h, p["conv2"]["w"], p["conv2"]["b"], residual=skip)


def _nonlocal_block(x, p, num_groups):
    h = pallas_groupnorm(x, p["gn"]["gamma"], p["gn"]["beta"], num_groups,
                         apply_swish=False)
    q = conv1x1(h, p["q"]["w"], p["q"]["b"])
    k = conv1x1(h, p["k"]["w"], p["k"]["b"])
    v = conv1x1(h, p["v"]["w"], p["v"]["b"])
    N, H, W, C = q.shape
    HW = H * W
    a = pallas_attention(q.reshape(N, HW, C), k.reshape(N, HW, C),
                         v.reshape(N, HW, C),
                         scale=float(C) ** (-0.5)).reshape(N, H, W, C)
    # x + proj_out(A): residual fused into the projection matmul kernel
    return conv1x1(a, p["proj"]["w"], p["proj"]["b"], residual=x)


def encoder_forward(layers, x_nchw, num_groups):
    # layout: NCHW at the boundary, NHWC (bf16) internally
    x = jnp.transpose(x_nchw, (0, 2, 3, 1)).astype(jnp.bfloat16)
    for kind, p in layers:
        if kind == "conv3x3":
            x = conv3x3_s1(x, p["w"], p["b"])
        elif kind == "residual":
            x = _residual_block(x, p, num_groups)
        elif kind == "nonlocal":
            x = _nonlocal_block(x, p, num_groups)
        elif kind == "downsample":
            x = downsample(x, p["w"], p["b"])
        elif kind == "groupnorm_swish":
            x = pallas_groupnorm(x, p["gamma"], p["beta"], num_groups,
                                 apply_swish=True)
        else:
            raise ValueError(kind)
    return jnp.transpose(x, (0, 3, 1, 2)).astype(jnp.float32)


# ----------------------------------- main ------------------------------------

if __name__ == "__main__":
    class Args:
        pass

    args = Args()
    args.image_channels = 3
    args.latent_dim = 8

    # Same topology as the PyTorch module (5 stages, 2 res-blocks/stage,
    # 4 downsamples, attention at the hard-coded resolution==16 stage, tail
    # res/attn/res/GN+Swish/conv).  Channel widths and GroupNorm group count
    # are scaled down (128..512,32 -> 8..32,4) so the demo runs at small shapes
    # (kernels pad channels to lane width internally).
    channels = (8, 8, 8, 16, 16, 32)
    num_groups = 4

    key = jax.random.PRNGKey(0)
    pkey, xkey = jax.random.split(key)
    layers = build_encoder_params(pkey, args.image_channels, args.latent_dim,
                                  channels=channels, resolution=256,
                                  attn_resolutions=(16,), res_block_cnt=2)

    x = jax.random.normal(xkey, (2, args.image_channels, 32, 32), jnp.float32)  # NCHW

    out = encoder_forward(layers, x, num_groups)
    out = jax.block_until_ready(out)

    # 32 -> 16 -> 8 -> 4 -> 2 spatial after the 4 downsample blocks
    assert out.shape == (2, args.latent_dim, 2, 2), out.shape
    assert bool(jnp.all(jnp.isfinite(out)))
    print("KERNEL_OK")
</pallas_src>

<mosaic_0001>
module attributes {stable_mosaic.version = 11 : i64} {
  func.func @_conv3_kernel(%arg0: i32, %arg1: i32, %arg2: memref<1x320x384xbf16, #tpu.memory_space<vmem>>, %arg3: memref<3x384x128xbf16, #tpu.memory_space<vmem>>, %arg4: memref<1x128xf32, #tpu.memory_space<vmem>>, %arg5: memref<1x256x128xbf16, #tpu.memory_space<vmem>>) attributes {dimension_semantics = [#tpu.dimension_semantics<parallel>, #tpu.dimension_semantics<parallel>], iteration_bounds = array<i64: 8, 1>, scalar_prefetch = 0 : i64, scratch_operands = 0 : i64, tpu.core_type = #tpu.core_type<tc>, window_params = [{transform_indices = @transform_0, window_bounds = array<i64: 1, 320, 384>}, {transform_indices = @transform_1, window_bounds = array<i64: 3, 384, 128>}, {transform_indices = @transform_2, window_bounds = array<i64: 1, 128>}, {transform_indices = @transform_3, window_bounds = array<i64: 1, 256, 128>}]} {
    %cst = arith.constant 0.000000e+00 : f32
    %0 = vector.broadcast %cst : f32 to vector<256x128xf32>
    %c0 = arith.constant 0 : index
    %c0_0 = arith.constant 0 : index
    %c0_1 = arith.constant 0 : index
    %1 = vector.load %arg2[%c0, %c0_0, %c0_1] : memref<1x320x384xbf16, #tpu.memory_space<vmem>>, vector<1x256x384xbf16>
    %2 = vector.shape_cast %1 : vector<1x256x384xbf16> to vector<256x384xbf16>
    %c0_2 = arith.constant 0 : index
    %c0_3 = arith.constant 0 : index
    %c0_4 = arith.constant 0 : index
    %3 = vector.load %arg3[%c0_2, %c0_3, %c0_4] : memref<3x384x128xbf16, #tpu.memory_space<vmem>>, vector<1x384x128xbf16>
    %4 = vector.shape_cast %3 : vector<1x384x128xbf16> to vector<384x128xbf16>
    %cst_5 = arith.constant dense<0.000000e+00> : vector<256x128xf32>
    %5 = tpu.matmul %2, %4, %cst_5 {dimension_numbers = #tpu.dot_dimension_numbers<[1], [0], [0], [1], [0, 0, 1, 1], [], []>} : vector<256x384xbf16>, vector<384x128xbf16>, vector<256x128xf32> -> vector<256x128xf32>
    %6 = arith.addf %0, %5 : vector<256x128xf32>
    %c0_6 = arith.constant 0 : index
    %c32 = arith.constant 32 : index
    %c0_7 = arith.constant 0 : index
    %7 = vector.load %arg2[%c0_6, %c32, %c0_7] : memref<1x320x384xbf16, #tpu.memory_space<vmem>>, vector<1x256x384xbf16>
    %8 = vector.shape_cast %7 : vector<1x256x384xbf16> to vector<256x384xbf16>
    %c1 = arith.constant 1 : index
    %c0_8 = arith.constant 0 : index
    %c0_9 = arith.constant 0 : index
    %9 = vector.load %arg3[%c1, %c0_8, %c0_9] : memref<3x384x128xbf16, #tpu.memory_space<vmem>>, vector<1x384x128xbf16>
    %10 = vector.shape_cast %9 : vector<1x384x128xbf16> to vector<384x128xbf16>
    %cst_10 = arith.constant dense<0.000000e+00> : vector<256x128xf32>
    %11 = tpu.matmul %8, %10, %cst_10 {dimension_numbers = #tpu.dot_dimension_numbers<[1], [0], [0], [1], [0, 0, 1, 1], [], []>} : vector<256x384xbf16>, vector<384x128xbf16>, vector<256x128xf32> -> vector<256x128xf32>
    %12 = arith.addf %6, %11 : vector<256x128xf32>
    %c0_11 = arith.constant 0 : index
    %c64 = arith.constant 64 : index
    %c0_12 = arith.constant 0 : index
    %13 = vector.load %arg2[%c0_11, %c64, %c0_12] : memref<1x320x384xbf16, #tpu.memory_space<vmem>>, vector<1x256x384xbf16>
    %14 = vector.shape_cast %13 : vector<1x256x384xbf16> to vector<256x384xbf16>
    %c2 = arith.constant 2 : index
    %c0_13 = arith.constant 0 : index
    %c0_14 = arith.constant 0 : index
    %15 = vector.load %arg3[%c2, %c0_13, %c0_14] : memref<3x384x128xbf16, #tpu.memory_space<vmem>>, vector<1x384x128xbf16>
    %16 = vector.shape_cast %15 : vector<1x384x128xbf16> to vector<384x128xbf16>
    %cst_15 = arith.constant dense<0.000000e+00> : vector<256x128xf32>
    %17 = tpu.matmul %14, %16, %cst_15 {dimension_numbers = #tpu.dot_dimension_numbers<[1], [0], [0], [1], [0, 0, 1, 1], [], []>} : vector<256x384xbf16>, vector<384x128xbf16>, vector<256x128xf32> -> vector<256x128xf32>
    %18 = arith.addf %12, %17 : vector<256x128xf32>
    %c0_16 = arith.constant 0 : index
    %c0_17 = arith.constant 0 : index
    %19 = vector.load %arg4[%c0_16, %c0_17] : memref<1x128xf32, #tpu.memory_space<vmem>>, vector<1x128xf32>
    %20 = vector.broadcast %19 : vector<1x128xf32> to vector<256x128xf32>
    %21 = arith.addf %18, %20 : vector<256x128xf32>
    %22 = arith.truncf %21 : vector<256x128xf32> to vector<256x128xbf16>
    %c0_18 = arith.constant 0 : index
    %c0_19 = arith.constant 0 : index
    %c0_20 = arith.constant 0 : index
    %23 = vector.load %arg5[%c0_18, %c0_19, %c0_20] : memref<1x256x128xbf16, #tpu.memory_space<vmem>>, vector<1x256x128xbf16>
    %24 = vector.shape_cast %23 : vector<1x256x128xbf16> to vector<256x128xbf16>
    %25 = vector.shape_cast %22 : vector<256x128xbf16> to vector<1x256x128xbf16>
    tpu.vector_store %arg5[%c0_18, %c0_19, %c0_20], %25 {strides = array<i32>} : memref<1x256x128xbf16, #tpu.memory_space<vmem>>, vector<1x256x128xbf16>,
    return
  }
  func.func @transform_0(%arg0: i32, %arg1: i32) -> (i32, i32, i32) {
    %c0_i32 = arith.constant 0 : i32
    %c0_i32_0 = arith.constant 0 : i32
    %c0_i32_1 = arith.constant 0 : i32
    return %arg0, %c0_i32, %c0_i32_0 : i32, i32, i32
  }
  func.func @transform_1(%arg0: i32, %arg1: i32) -> (i32, i32, i32) {
    %c0_i32 = arith.constant 0 : i32
    %c0_i32_0 = arith.constant 0 : i32
    %c0_i32_1 = arith.constant 0 : i32
    return %c0_i32, %c0_i32_0, %arg1 : i32, i32, i32
  }
  func.func @transform_2(%arg0: i32, %arg1: i32) -> (i32, i32) {
    %c0_i32 = arith.constant 0 : i32
    %c0_i32_0 = arith.constant 0 : i32
    return %c0_i32, %arg1 : i32, i32
  }
  func.func @transform_3(%arg0: i32, %arg1: i32) -> (i32, i32, i32) {
    %c0_i32 = arith.constant 0 : i32
    %c0_i32_0 = arith.constant 0 : i32
    return %arg0, %c0_i32, %arg1 : i32, i32, i32
  }
}

</mosaic_0001>

<bundles_post_ra>
// kernel: tpu_custom_call.1
= control target key start
LH: loop header
LB: loop body
LE: loop exit
PB: predicated region body
PF: predicated region fallthrough
CT: control target
= control target key end

     0   :  { %8 = vsyncpa [#allocation3], 0  ;;  %s5239_s0 = inlined_call_operand.hbm [shape: bf16[8,320,384], index: 0, kind: input, shape index: {}]   ;;  %s5240_s1 = inlined_call_operand.hbm [shape: bf16[3,384,128], index: 1, kind: input, shape index: {}]   ;;  %s5241_s2 = inlined_call_operand.hbm [shape: f32[1,128], index: 2, kind: input, shape index: {}]   ;;  %s5242_s3 = inlined_call_operand.hbm [shape: bf16[8,256,128], index: 3, kind: output, shape index: {}]  }
   0x1   :  { %10 = vsyncpa [#allocation3 + $0x1], 0 }
   0x2   :  { %11 = vsyncpa [#allocation6], 0 }
   0x3   :  { %12 = vsyncpa [#allocation4], 0 }
   0x4   :  { %14 = vsyncpa [#allocation4 + $0x1], 0  ;;  %s4362_s12 = smov 0   ;;  %s4364_s13 = smov 0  }
   0x5   :  { %s4366_s14 = smov 0   ;;  %s4368_s15 = smov 0  }
   0x6   :  { %s4370_s16 = smov 0   ;;  %s4372_s17 = smov 0  }
   0x7 LB: > { %s2821_s18 = sadd.s32 4294967295, %s4330_s17   ;;  %s2822_s19 = sadd.s32 4294967294, %s4330_s17   ;;  %s4330_s17 = sphi %s4372_s17, %s20_s17   ;;  %s4326_s16 = sphi %s4370_s16, %s5268_s16   ;;  %s4322_s15 = sphi %s4368_s15, %s5267_s15   ;;  %s4318_s14 = sphi %s4366_s14, %s5266_s14   ;;  %s4314_s13 = sphi %s4364_s13, %s5265_s13   ;;  %s4310_s12 = sphi %s4362_s12, %s5264_s12  }
   0x8   : > { %p52_p0 = scmp.ne.s32.totalorder %s4314_s13, %s4310_s12  ;;  %p4396_p1 = scmp.eq.s32.totalorder %s2821_s18, 0 }
   0x9   : > { %p4400_p2 = scmp.eq.s32.totalorder %s2821_s18, 7  ;;  %p136_p3 = scmp.eq.s32.totalorder %s2822_s19, 7 }
   0xa   : > { %s5247_s20 = scalar_select %p4396_p1, 1, 0 }
   0xb   : > { %s5248_s21 = scalar_select %p4400_p2, 1, 0 }
   0xc   : > { %p4406_p4 = por %p4396_p1, %p52_p0  ;;  %p2823_p5 = scmp.ge.s32.totalorder %s4330_s17, 1 }
   0xd   : > { %p4411_p6 = por %p136_p3, %p52_p0  ;;  %p143_p7 = scmp.lt.s32.totalorder %s4330_s17, 9 }
   0xe   : > { %s5249_s22 = scalar_select %p4406_p4, 1, 0 }
   0xf   : > { %s5250_s23 = scalar_select %p4411_p6, 1, 0 }
  0x10   : > { %p4416_p8 = pnand %p2823_p5, %p143_p7  ;;  %s4332_s25 = smov [#allocation5]  }
  0x11   : > { %s157_s26 = sshll.u32 %s4332_s25, 4  ;;  %s4333_s28 = smov [#allocation7]   ;;  %s158_s26 = int_to_ptr.vmem [resolvable:$true] %s157_s26 }
  0x12   : > { %s5251_s24 = scalar_select %p4416_p8, 1, 0 }
  0x13   : > { %p3915_p9 = pneg %p4416_p8  ;;  %s173_s29 = sshll.u32 %s4333_s28, 4  ;;  %s4428_s29 = int_to_ptr.vmem [resolvable:$true] %s173_s29 }
  0x14   : > { %s4158_s5 = scalar_lea.hbm %s5240_s1, 9216 }
  0x15   : > { %p4424_p10 = pnand %p3915_p9, %p4396_p1  ;;  %p4159_p11 = scmp.ne.s32.totalorder %s5240_s1, %s4158_s5 }
  0x16   : > { %p4165_p3 = scmp.lt.u32.totalorder %s4158_s5, %s5240_s1 }
  0x17   : > { %p4160_p12 = pneg %p4424_p10 }
  0x19   : > { %p4161_p13 = pnand %p4160_p12, %p4159_p11 }
  0x1b   : > { %p4162_p0 = pneg %p4161_p13 }
  0x1d   : > { %p4167_p5 = pnand %p4165_p3, %p4162_p0 }
  0x1f   : > { %4170 = shalt.err (!%p4167_p5)
}
  0x20   : > { %s4171_s10 = scalar_lea.vmem %s158_s26, 9216  ;;  %p4179_p1 = scmp.lt.s32.totalorder %s158_s26, %s158_s26 }
  0x21   : > { %p4172_p7 = scmp.ne.s32.totalorder %s158_s26, %s4171_s10  ;;  %p4180_p4 = scmp.lt.s32.totalorder %s4171_s10, %s4171_s10 }
  0x23   : > { %p4174_p9 = pnand %p4172_p7, %p4160_p12  ;;  %p4181_p8 = por %p4180_p4, %p4179_p1 }
  0x25   : > { %p4175_p6 = pneg %p4174_p9 }
  0x27   : > { %p4182_p2 = pnand %p4181_p8, %p4175_p6 }
  0x29   : > { %4185 = shalt.err (!%p4182_p2)
}
  0x2a   : > { %s4334_s11 = smov 64   ;;  %s4335_s18 = smov 4  }
  0x2b   : > { %3918 = dma.hbm_to_vmem [thread:$0]  (!%p4424_p10), %s5240_s1, 9216, %s158_s26, [#allocation6], %s4334_s11, %s4334_s11, %s4335_s18  }
  0x2c   : > { %s4186_s4 = scalar_lea.hbm %s5241_s2, 16 }
  0x2d   : > { %p4187_p11 = scmp.ne.s32.totalorder %s5241_s2, %s4186_s4  ;;  %p4193_p4 = scmp.lt.u32.totalorder %s4186_s4, %s5241_s2 }
  0x2f   : > { %p4189_p1 = pnand %p4187_p11, %p4160_p12 }
  0x31   : > { %p4190_p2 = pneg %p4189_p1 }
  0x33   : > { %p4195_p6 = pnand %p4193_p4, %p4190_p2 }
  0x35   : > { %4198 = shalt.err (!%p4195_p6)
}
  0x36   : > { %s4199_s26 = scalar_lea.vmem %s4428_s29, 16  ;;  %s4206_s9 = scalar_lea.vmem %s4428_s29, 32 }
  0x37   : > { %p4200_p8 = scmp.ne.s32.totalorder %s4428_s29, %s4199_s26  ;;  %p4207_p3 = scmp.lt.s32.totalorder %s4428_s29, %s4428_s29 }
  0x38   : > { %p4208_p5 = scmp.lt.s32.totalorder %s4206_s9, %s4199_s26 }
  0x39   : > { %p4202_p13 = pnand %p4200_p8, %p4160_p12 }
  0x3a   : > { %p4209_p7 = por %p4208_p5, %p4207_p3 }
  0x3b   : > { %p4203_p0 = pneg %p4202_p13 }
  0x3d   : > { %p4210_p9 = pnand %p4209_p7, %p4203_p0 }
  0x3f   : > { %4213 = shalt.err (!%p4210_p9)
}
  0x40   : > { %3921 = dma.hbm_to_vmem [thread:$0]  (!%p4424_p10), %s5241_s2, 16, %s4428_s29, [#allocation6]  }
  0x41   : > { %s32_s18 = sadd.s32 1, %s4326_s16  ;;  %s39_s19 = sadd.s32 1, %s4318_s14 }
  0x42   : > { %p34_p12 = scmp.ge.s32.totalorder %s32_s18, 8  ;;  %p46_p11 = scmp.ne.s32.totalorder %s4318_s14, %s4314_s13 }
  0x43   : > { %p47_p1 = scmp.eq.s32.totalorder %s4330_s17, 0  ;;  %p3932_p2 = scmp.lt.s32.totalorder %s4330_s17, 8 }
  0x44   : > { %s5270_s18 = smov (%p34_p12, %s32_s18), 0  ;;  %p5253_p6 = scmp.ne.s32.totalorder %s5248_s21, 0 }
  0x45   : > { %p48_p4 = por %p47_p1, %p46_p11  ;;  %s36_s25 = ssub.s32 %s4326_s16, %s5270_s18 }
  0x46   : > { %p4488_p8 = por %p5253_p6, %p46_p11  ;;  %s184_s28 = sand.u32 1, %s4318_s14  }
  0x47   : > { %p37_p13 = scmp.eq.s32.totalorder %s36_s25, 0  ;;  %s3900_s29 = smul.u32 480, %s184_s28 }
  0x48   : > { %p4495_p10 = pnand %p3932_p2, %p48_p4  ;;  %s3901_s5 = smul.u32 7680, %s4326_s16 }
  0x49   : > { %s4500_s4 = scalar_select %p37_p13, %s4318_s14, %s39_s19  }
  0x4a   : > { %s188_s6 = scalar_lea.vmem [#allocation2], %s3900_s29  ;;  %s4506_s26 = scalar_lea.hbm %s5239_s0, %s3901_s5 }
  0x4b   : > { %s195_s7 = sshll.u32 %s188_s6, 4  ;;  %s4510_s9 = scalar_lea.sflag [#allocation3], %s184_s28  ;;  %s4508_s7 = int_to_ptr.vmem [resolvable:$true] %s195_s7 }
  0x4c   : > { %s4214_s10 = scalar_lea.hbm %s4506_s26, 7680  ;;  %p4216_p3 = pneg %p4495_p10 }
  0x4d   : > { %p4215_p0 = scmp.ne.s32.totalorder %s4506_s26, %s4214_s10  ;;  %s4219_s25 = scalar_lea.hbm %s5239_s0, 61440 }
  0x4e   : > { %p4220_p9 = scmp.lt.u32.totalorder %s4506_s26, %s5239_s0  ;;  %p4221_p12 = scmp.lt.u32.totalorder %s4219_s25, %s4214_s10 }
  0x4f   : > { %p4217_p5 = pnand %p4216_p3, %p4215_p0  ;;  %p4223_p1 = scmp.lt.u32.totalorder %s4214_s10, %s4506_s26 }
  0x50   : > { %p4222_p11 = por %p4221_p12, %p4220_p9 }
  0x51   : > { %p4218_p7 = pneg %p4217_p5 }
  0x52   : > { %p4224_p2 = por %p4223_p1, %p4222_p11 }
  0x54   : > { %p4225_p4 = pnand %p4224_p2, %p4218_p7 }
  0x56   : > { %4228 = shalt.err (!%p4225_p4)
}
  0x57   : > { %s4229_s28 = scalar_lea.vmem %s4508_s7, 7680  ;;  %s4336_s6 = smov [#allocation2]  }
  0x58   : > { %p4230_p6 = scmp.ne.s32.totalorder %s4508_s7, %s4229_s28  ;;  %s4234_s21 = sshll.u32 %s4336_s6, 4  ;;  %s4235_s21 = int_to_ptr.vmem [resolvable:$false] %s4234_s21 }
  0x59   : > { %s4236_s8 = scalar_lea.vmem %s4235_s21, 15360  ;;  %p4237_p5 = scmp.lt.s32.totalorder %s4508_s7, %s4235_s21 }
  0x5a   : > { %p4232_p13 = pnand %p4230_p6, %p4216_p3  ;;  %p4238_p9 = scmp.lt.s32.totalorder %s4236_s8, %s4229_s28 }
  0x5c   : > { %p4233_p0 = pneg %p4232_p13  ;;  %p4239_p12 = por %p4238_p9, %p4237_p5 }
  0x5e   : > { %p4240_p11 = pnand %p4239_p12, %p4233_p0 }
  0x60   : > { %4243 = shalt.err (!%p4240_p11)
}
  0x61   : > { %s4337_s10 = smov 192   ;;  %s4338_s11 = smov 12  }
  0x62   : > { %3925 = dma.hbm_to_vmem [thread:$0]  (!%p4495_p10), %s4506_s26, 7680, %s4508_s7, %s4510_s9, %s4337_s10, %s4337_s10, %s4338_s11  }
  0x63   : > { %p5256_p3 = scmp.ne.s32.totalorder %s5251_s24, 0 }
  0x65   : > { %207 = sbr.rel (%p5256_p3) target bundleno = 670 (0x29e), region = 32 }
  0x6c   : > { %s4541_s19 = sand.u32 1, %s4314_s13   ;;  %p5257_p7 = scmp.ne.s32.totalorder %s5249_s22, 0 }
  0x6d   : > { %s3902_s25 = smul.u32 480, %s4541_s19  ;;  %s210_s29 = scalar_lea.sflag [#allocation3], %s4541_s19 }
  0x6f   : > { %s4545_s5 = scalar_lea.vmem [#allocation2], %s3902_s25 }
  0x70   : > { %4297 = dma.done.wait (%p5257_p7), %s210_s29, 7680  }
  0x71   : > { %4299 = vsyncadd (%p5257_p7), %s210_s29, 4294959616  ;;  %p5258_p10 = scmp.ne.s32.totalorder %s5247_s20, 0 }
  0x73   : > { %4301 = dma.done.wait (%p5258_p10), [#allocation6], 9232  }
  0x74   : > { %4303 = vsyncadd (%p5258_p10), [#allocation6], 4294958064  ;;  %v3992_v0 = vld [vmem:[#allocation5 + $0x100] sm:$0xff]   ;;  %v3995_v3 = vld [vmem:[#allocation5 + $0x108] sm:$0xff]   ;;  %s2831_s20 = sshll.u32 %s4541_s19, 7  ;;  %s3076_s24 = sshll.u32 %s4322_s15, 11 }
  0x75   : > { %v4555_v1 = vld [vmem:[#allocation5 + $0x140] sm:$0xff]   ;;  %3172 = vmatprep.subr.bf16.mxu0 %v3992_v0  ;;  %v4559_v4 = vld [vmem:[#allocation5 + $0x148] sm:$0xff]   ;;  %v3998_v6 = vld [vmem:[#allocation5 + $0x110] sm:$0xff]   ;;  %s5105_s22 = scalar_lea.vmem [#allocation8], %s2831_s20  ;;  %s5188_s9 = scalar_lea.hbm %s5242_s3, %s3076_s24 }
  0x76   : > { %v3994_v2 = vld [vmem:[#allocation5 + $0xc0] sm:$0xff]   ;;  %3724 = vmatprep.subr.bf16.mxu1 %v4555_v1  ;;  %v3997_v5 = vld [vmem:[#allocation5 + $0xc8] sm:$0xff]   ;;  %v4562_v7 = vld [vmem:[#allocation5 + $0x150] sm:$0xff]   ;;  %s2715_s30 = sshll.u32 %s5105_s22, 4  ;;  %s2701_s28 = scalar_lea.sflag [#allocation4], %s4541_s19  ;;  %s5190_s30 = int_to_ptr.vmem [resolvable:$true] %s2715_s30 }
  0x77   : > { %3173 = vmatpush3.bf16.msra.mxu0 %v3994_v2  ;;  %3732 = vmatpush3.bf16.msra.mxu1 %v4555_v1  ;;  %v4000_v8 = vld [vmem:[#allocation5 + $0xd0] sm:$0xff]   ;;  %v4001_v9 = vld [vmem:[#allocation5 + $0x118] sm:$0xff]   ;;  %v4004_v12 = vld [vmem:[#allocation5 + $0x120] sm:$0xff]   ;;  %s4244_s15 = scalar_lea.vmem %s5190_s30, 2048  ;;  %s4339_s6 = smov [#allocation8]  }
  0x78   : > { %3174 = vmatprep.subr.bf16.mxu0 %v3995_v3  ;;  %3725 = vmatprep.subr.bf16.mxu1 %v4559_v4  ;;  %v4566_v10 = vld [vmem:[#allocation5 + $0x158] sm:$0xff]   ;;  %v4570_v13 = vld [vmem:[#allocation5 + $0x160] sm:$0xff]   ;;  %v4007_v15 = vld [vmem:[#allocation5 + $0x128] sm:$0xff]   ;;  %p4245_p1 = scmp.ne.s32.totalorder %s5190_s30, %s4244_s15  ;;  %s4248_s21 = sshll.u32 %s4339_s6, 4  ;;  %s4249_s21 = int_to_ptr.vmem [resolvable:$false] %s4248_s21 }
  0x79   : > { %v4003_v11 = vld [vmem:[#allocation5 + $0xd8] sm:$0xff]   ;;  %v4006_v14 = vld [vmem:[#allocation5 + $0xe0] sm:$0xff]   ;;  %v4574_v16 = vld [vmem:[#allocation5 + $0x168] sm:$0xff]   ;;  %s4250_s8 = scalar_lea.vmem %s4249_s21, 4096  ;;  %p4251_p6 = scmp.lt.s32.totalorder %s5190_s30, %s4249_s21 }
  0x7a   : > { %v4009_v17 = vld [vmem:[#allocation5 + $0xe8] sm:$0xff]   ;;  %v4010_v18 = vld [vmem:[#allocation5 + $0x130] sm:$0xff]   ;;  %v4013_v21 = vld [vmem:[#allocation5 + $0x138] sm:$0xff]   ;;  %p4246_p2 = pnand %p4245_p1, %p4488_p8  ;;  %p4252_p13 = scmp.lt.s32.totalorder %s4250_s8, %s4244_s15 }
  0x7b   : > { %3175 = vmatpush3.bf16.msra.mxu0 %v3997_v5  ;;  %3733 = vmatpush3.bf16.msra.mxu1 %v4559_v4  ;;  %v4578_v19 = vld [vmem:[#allocation5 + $0x170] sm:$0xff]   ;;  %v4581_v22 = vld [vmem:[#allocation5 + $0x178] sm:$0xff]   ;;  %v4021_v26 = vld [vmem:[#allocation5 + $0x40] sm:$0xff]  }
  0x7c   : > { %3176 = vmatprep.subr.bf16.mxu0 %v3998_v6  ;;  %3726 = vmatprep.subr.bf16.mxu1 %v4562_v7  ;;  %v4012_v20 = vld [vmem:[#allocation5 + $0xf0] sm:$0xff]   ;;  %v4588_v24 = vld [vmem:[%s4545_s5 + $0xf8] ss:$12 sps:$4 sm:$0xff]   ;;  %v4023_v30 = vld [vmem:[#allocation5 + $0x48] sm:$0xff]   ;;  %p4247_p4 = pneg %p4246_p2  ;;  %p4253_p0 = por %p4252_p13, %p4251_p6 }
  0x7d   : > { %v4585_v23 = vld [vmem:[%s4545_s5 + $0x34] ss:$12 sps:$4 sm:$0xff]   ;;  %v4015_v25 = vld [vmem:[#allocation5 + $0xf8] sm:$0xff]   ;;  %3612 = vmatprep.mubr.bf16.mxu1 %v4588_v24  ;;  %v4024_v33 = vld [vmem:[#allocation5 + $0x8] sm:$0xff]  }
  0x7e   : > { %846 = vmatprep.mubr.bf16.mxu0 %v4585_v23  ;;  %v4594_v27 = vld [vmem:[%s4545_s5 + $0x30] ss:$12 sps:$4 sm:$0xff]   ;;  %v4022_v29 = vld [vmem:[#allocation5] sm:$0xff]   ;;  %v4603_v31 = vld [vmem:[%s4545_s5 + $0x4c] ss:$12 sps:$4 sm:$0xff]   ;;  %p4254_p5 = pnand %p4253_p0, %p4247_p4 }
  0x7f   : > { %3177 = vmatpush3.bf16.msra.mxu0 %v4000_v8  ;;  %3734 = vmatpush3.bf16.msra.mxu1 %v4562_v7  ;;  %v4598_v28 = vld [vmem:[%s4545_s5 + $0x110] ss:$12 sps:$4 sm:$0xff]   ;;  %v4606_v32 = vld [vmem:[%s4545_s5 + $0x128] ss:$12 sps:$4 sm:$0xff]   ;;  %v4617_v36 = vld [vmem:[%s4545_s5 + $0x140] ss:$12 sps:$4 sm:$0xff]  }
  0x80   : > { %3178 = vmatprep.subr.bf16.mxu0 %v4001_v9  ;;  %3727 = vmatprep.subr.bf16.mxu1 %v4566_v10  ;;  %v4613_v34 = vld [vmem:[%s4545_s5 + $0x48] ss:$12 sps:$4 sm:$0xff]   ;;  %v4032_v38 = vld [vmem:[#allocation5 + $0x58] sm:$0xff]   ;;  %v4621_v39 = vld [vmem:[%s4545_s5 + $0x64] ss:$12 sps:$4 sm:$0xff]  }
  0x81   : > { %v4030_v35 = vld [vmem:[#allocation5 + $0x50] sm:$0xff]   ;;  %v4625_v40 = vld [vmem:[%s4545_s5 + $0x158] ss:$12 sps:$4 sm:$0xff]   ;;  %v4633_v42 = vld [vmem:[%s4545_s5 + $0x60] ss:$12 sps:$4 sm:$0xff]  }
  0x82   : > { %v4031_v37 = vld [vmem:[#allocation5 + $0x10] sm:$0xff]   ;;  %v4033_v41 = vld [vmem:[#allocation5 + $0x18] sm:$0xff]   ;;  %v4039_v44 = vld [vmem:[#allocation5 + $0x60] sm:$0xff]  }
  0x83   : > { %3179 = vmatpush3.bf16.msra.mxu0 %v4003_v11  ;;  %3735 = vmatpush3.bf16.msra.mxu1 %v4566_v10  ;;  %v4636_v43 = vld [vmem:[%s4545_s5 + $0x170] ss:$12 sps:$4 sm:$0xff]   ;;  %v4040_v45 = vld [vmem:[#allocation5 + $0x20] sm:$0xff]   ;;  %v4041_v46 = vld [vmem:[#allocation5 + $0x68] sm:$0xff]  }
  0x84   : > { %3180 = vmatprep.subr.bf16.mxu0 %v4004_v12  ;;  %3728 = vmatprep.subr.bf16.mxu1 %v4570_v13  ;;  %v4641_v47 = vld [vmem:[%s4545_s5 + $0x7c] ss:$12 sps:$4 sm:$0xff]   ;;  %v4048_v50 = vld [vmem:[#allocation5 + $0x70] sm:$0xff]   ;;  %v4649_v51 = vld [vmem:[%s4545_s5 + $0x78] ss:$12 sps:$4 sm:$0xff]  }
  0x85   : > { %v4045_v48 = vld [vmem:[%s4545_s5 + $0x188] ss:$12 sps:$4 sm:$0xff]   ;;  %v4047_v52 = vld [vmem:[%s4545_s5 + $0x1a0] ss:$12 sps:$4 sm:$0xff]   ;;  %v4050_v54 = vld [vmem:[#allocation5 + $0x78] sm:$0xff]  }
  0x86   : > { %v4042_v49 = vld [vmem:[#allocation5 + $0x28] sm:$0xff]   ;;  %v4049_v53 = vld [vmem:[#allocation5 + $0x30] sm:$0xff]   ;;  %v4051_v57 = vld [vmem:[#allocation5 + $0x38] sm:$0xff]  }
  0x87   : > { %3181 = vmatpush3.bf16.msra.mxu0 %v4006_v14  ;;  %3736 = vmatpush3.bf16.msra.mxu1 %v4570_v13  ;;  %v4655_v55 = vld [vmem:[%s4545_s5 + $0x94] ss:$12 sps:$4 sm:$0xff]   ;;  %v4056_v56 = vld [vmem:[%s4545_s5 + $0x4] ss:$12 sps:$4 sm:$0xff]   ;;  %v4668_v61 = vld [vmem:[%s4545_s5 + $0xac] ss:$12 sps:$4 sm:$0xff]  }
  0x88   : > { %3182 = vmatprep.subr.bf16.mxu0 %v4007_v15  ;;  %3729 = vmatprep.subr.bf16.mxu1 %v4574_v16  ;;  %v4058_v58 = vld [vmem:[#allocation5 + $0x80] sm:$0xff]   ;;  %v4664_v60 = vld [vmem:[%s4545_s5 + $0x90] ss:$12 sps:$4 sm:$0xff]   ;;  %v4068_v63 = vld [vmem:[#allocation5 + $0x88] sm:$0xff]  }
  0x89   : > { %v4054_v59 = vld [vmem:[%s4545_s5] ss:$12 sps:$4 sm:$0xff]   ;;  %v4061_v62 = vld [vmem:[%s4545_s5 + $0x1c] ss:$12 sps:$4 sm:$0xff]   ;;  %v4075_v0 = vld [vmem:[#allocation5 + $0x90] sm:$0xff]  }
  0x8a   : > { %v4064_v2 = vld [vmem:[%s4545_s5 + $0x18] ss:$12 sps:$4 sm:$0xff]   ;;  %v4687_v5 = vld [vmem:[%s4545_s5 + $0xc0] ss:$12 sps:$4 sm:$0xff]  }
  0x8b   : > { %3183 = vmatpush3.bf16.msra.mxu0 %v4009_v17  ;;  %3737 = vmatpush3.bf16.msra.mxu1 %v4574_v16  ;;  %v4681_v3 = vld [vmem:[%s4545_s5 + $0xc4] ss:$12 sps:$4 sm:$0xff]   ;;  %v4096_v9 = vld [vmem:[#allocation5 + $0xa8] sm:$0xff]   ;;  %v4700_v12 = vld [vmem:[%s4545_s5 + $0xf4] ss:$12 sps:$4 sm:$0xff]  }
  0x8c   : > { %3184 = vmatprep.subr.bf16.mxu0 %v4010_v18  ;;  %3730 = vmatprep.subr.bf16.mxu1 %v4578_v19  ;;  %v4089_v6 = vld [vmem:[#allocation5 + $0xa0] sm:$0xff]   ;;  %v4117_v14 = vld [vmem:[#allocation5 + $0xb8] sm:$0xff]  }
  0x8d   : > { %v4102_v8 = vld [vmem:[#allocation5 + $0x1c0] sm:$0xff]   ;;  %v4710_v15 = vld [vmem:[%s4545_s5 + $0x10c] ss:$12 sps:$4 sm:$0xff]  }
  0x8e   : > { %v4697_v11 = vld [vmem:[%s4545_s5 + $0xd8] ss:$12 sps:$4 sm:$0xff]  }
  0x8f   : > { %3185 = vmatpush3.bf16.msra.mxu0 %v4012_v20  ;;  %3738 = vmatpush3.bf16.msra.mxu1 %v4578_v19  ;;  %v4720_v17 = vld [vmem:[%s4545_s5 + $0x124] ss:$12 sps:$4 sm:$0xff]   ;;  %v4733_v20 = vld [vmem:[%s4545_s5 + $0x13c] ss:$12 sps:$4 sm:$0xff]  }
  0x90   : > { %3186 = vmatprep.subr.bf16.mxu0 %v4013_v21  ;;  %3731 = vmatprep.subr.bf16.mxu1 %v4581_v22  ;;  %v4722_v18 = vld [vmem:[#allocation5 + $0x200] sm:$0xff]  }
  0x91   : > { %v4740_v21 = vld [vmem:[%s4545_s5 + $0x138] ss:$12 sps:$4 sm:$0xff]  }
  0x93   : > { %3187 = vmatpush3.bf16.msra.mxu0 %v4015_v25  ;;  %3739 = vmatpush3.bf16.msra.mxu1 %v4581_v22  ;;  %v4753_v25 = vld [vmem:[%s4545_s5 + $0x16c] ss:$12 sps:$4 sm:$0xff]  }
  0x94   : > { %3580 = vmatprep.subr.bf16.mxu0 %v4555_v1  ;;  %3308 = vmatprep.subr.bf16.mxu1 %v4021_v26  ;;  %v4760_v26 = vld [vmem:[%s4545_s5 + $0x168] ss:$12 sps:$4 sm:$0xff]  }
  0x96   : > { %847 = vmatmul.mubr.bf16.vlgmr.msra.gmra.mrb[0].mxu0 %v4594_v27  ;;  %3613 = vmatmul.mubr.bf16.vlgmr.msra.gmra.mrb[0].mxu1 %v4598_v28 }
  0x97   : > { %3581 = vmatpush3.bf16.msra.mxu0 %v4555_v1  ;;  %3309 = vmatpush3.bf16.msra.mxu1 %v4022_v29  ;;  %v4676_v1 = vld [vmem:[%s4545_s5 + $0xa8] ss:$12 sps:$4 sm:$0xff]   ;;  %v4770_v29 = vld [vmem:[%s4545_s5 + $0x180] ss:$12 sps:$4 sm:$0xff]  }
  0x98   : > { %3310 = vmatprep.subr.bf16.mxu1 %v4023_v30  ;;  %854 = vmatprep.mubr.bf16.mxu0 %v4603_v31  ;;  %v4773_v30 = vld [vmem:[%s4545_s5 + $0x19c] ss:$12 sps:$4 sm:$0xff]  }
  0x99   : > { %3616 = vmatprep.mubr.bf16.mxu1 %v4606_v32  ;;  %3582 = vmatprep.subr.bf16.mxu0 %v4559_v4 }
  0x9b   : > { %3311 = vmatpush3.bf16.msra.mxu1 %v4024_v33  ;;  %3583 = vmatpush3.bf16.msra.mxu0 %v4559_v4  ;;  %v4082_v4 = vld [vmem:[#allocation5 + $0x98] sm:$0xff]  }
  0x9c   : > { %3312 = vmatprep.subr.bf16.mxu1 %v4030_v35  ;;  %3584 = vmatprep.subr.bf16.mxu0 %v4562_v7  ;;  %v4783_v33 = vld [vmem:[%s4545_s5 + $0x38] ss:$12 sps:$4 sm:$0xff]  }
  0x9d   : > { %v4103_v35 = vld [vmem:[#allocation5 + $0x180] sm:$0xff]  }
  0x9e   : > { %855 = vmatmul.mubr.bf16.gmra.mrb[4].mxu0 %v4613_v34  ;;  %3617 = vmatmul.mubr.bf16.gmra.mrb[4].mxu1 %v4617_v36 }
  0x9f   : > { %3313 = vmatpush3.bf16.msra.mxu1 %v4031_v37  ;;  %862 = vmatprep.mubr.bf16.mxu0 %v4621_v39  ;;  %v4793_v37 = vld [vmem:[%s4545_s5 + $0x68] ss:$12 sps:$4 sm:$0xff]  }
  0xa0   : > { %3314 = vmatprep.subr.bf16.mxu1 %v4032_v38  ;;  %3620 = vmatprep.mubr.bf16.mxu1 %v4625_v40  ;;  %v4105_v38 = vld [vmem:[#allocation5 + $0x1c8] sm:$0xff]  }
  0xa1   : > { %3585 = vmatpush3.bf16.msra.mxu0 %v4562_v7  ;;  %v4690_v7 = vld [vmem:[%s4545_s5 + $0xdc] ss:$12 sps:$4 sm:$0xff]  }
  0xa2   : > { %3586 = vmatprep.subr.bf16.mxu0 %v4566_v10 }
  0xa3   : > { %3315 = vmatpush3.bf16.msra.mxu1 %v4033_v41  ;;  %v4106_v41 = vld [vmem:[#allocation5 + $0x188] sm:$0xff]  }
  0xa4   : > { %3316 = vmatprep.subr.bf16.mxu1 %v4039_v44  ;;  %v4109_v44 = vld [vmem:[#allocation5 + $0x1d0] sm:$0xff]  }
  0xa5   : > { %3587 = vmatpush3.bf16.msra.mxu0 %v4566_v10  ;;  %v4104_v10 = vld [vmem:[#allocation5 + $0xb0] sm:$0xff]  }
  0xa6   : > { %863 = vmatmul.mubr.bf16.gmra.mrb[8].mxu0 %v4633_v42  ;;  %3621 = vmatmul.mubr.bf16.gmra.mrb[8].mxu1 %v4636_v43 }
  0xa7   : > { %3317 = vmatpush3.bf16.msra.mxu1 %v4040_v45  ;;  %870 = vmatprep.mubr.bf16.mxu0 %v4641_v47  ;;  %v4800_v45 = vld [vmem:[%s4545_s5 + $0x80] ss:$12 sps:$4 sm:$0xff]  }
  0xa8   : > { %3318 = vmatprep.subr.bf16.mxu1 %v4041_v46  ;;  %3624 = vmatprep.mubr.bf16.mxu1 %v4045_v48  ;;  %v4110_v46 = vld [vmem:[#allocation5 + $0x190] sm:$0xff]   ;;  %v4113_v48 = vld [vmem:[%s4545_s5 + $0x98] ss:$12 sps:$4 sm:$0xff]  }
  0xa9   : > { %3588 = vmatprep.subr.bf16.mxu0 %v4570_v13 }
  0xaa   : > { %3589 = vmatpush3.bf16.msra.mxu0 %v4570_v13  ;;  %v4707_v13 = vld [vmem:[%s4545_s5 + $0xf0] ss:$12 sps:$4 sm:$0xff]  }
  0xab   : > { %3319 = vmatpush3.bf16.msra.mxu1 %v4042_v49  ;;  %3590 = vmatprep.subr.bf16.mxu0 %v4574_v16  ;;  %v4111_v49 = vld [vmem:[#allocation5 + $0x1d8] sm:$0xff]  }
  0xac   : > { %3320 = vmatprep.subr.bf16.mxu1 %v4048_v50  ;;  %v4112_v50 = vld [vmem:[#allocation5 + $0x198] sm:$0xff]  }
  0xae   : > { %871 = vmatmul.mubr.bf16.gmra.mrb[12].mxu0 %v4649_v51  ;;  %3625 = vmatmul.mubr.bf16.gmra.mrb[12].mxu1 %v4047_v52  ;;  %v4115_v52 = vld [vmem:[#allocation5 + $0x1e0] sm:$0xff]  }
  0xaf   : > { %3321 = vmatpush3.bf16.msra.mxu1 %v4049_v53  ;;  %878 = vmatprep.mubr.bf16.mxu0 %v4655_v55  ;;  %v4114_v53 = vld [vmem:[%s4545_s5 + $0xb0] ss:$12 sps:$4 sm:$0xff]  }
  0xb0   : > { %3322 = vmatprep.subr.bf16.mxu1 %v4050_v54  ;;  %1344 = vmatprep.mubr.bf16.mxu1 %v4056_v56  ;;  %v4116_v54 = vld [vmem:[#allocation5 + $0x1a0] sm:$0xff]   ;;  %v4120_v56 = vld [vmem:[%s4545_s5 + $0xc8] ss:$12 sps:$4 sm:$0xff]  }
  0xb1   : > { %3591 = vmatpush3.bf16.msra.mxu0 %v4574_v16  ;;  %v4717_v16 = vld [vmem:[%s4545_s5 + $0x108] ss:$12 sps:$4 sm:$0xff]  }
  0xb2   : > { %3592 = vmatprep.subr.bf16.mxu0 %v4578_v19 }
  0xb3   : > { %3323 = vmatpush3.bf16.msra.mxu1 %v4051_v57  ;;  %v4118_v57 = vld [vmem:[#allocation5 + $0x1e8] sm:$0xff]  }
  0xb4   : > { %3628 = vmatprep.subr.bf16.mxu1 %v4058_v58 }
  0xb5   : > { %3593 = vmatpush3.bf16.msra.mxu0 %v4578_v19  ;;  %v4730_v19 = vld [vmem:[%s4545_s5 + $0x120] ss:$12 sps:$4 sm:$0xff]  }
  0xb6   : > { %879 = vmatmul.mubr.bf16.gmra.mrb[16].mxu0 %v4664_v60  ;;  %1345 = vmatmul.mubr.bf16.vlgmr.msra.gmra.mrb[16].mxu1 %v4054_v59  ;;  %v4122_v59 = vld [vmem:[#allocation5 + $0x1f0] sm:$0xff]  }
  0xb7   : > { %3629 = vmatpush3.bf16.msra.mxu1 %v4058_v58  ;;  %886 = vmatprep.mubr.bf16.mxu0 %v4668_v61  ;;  %v4119_v58 = vld [vmem:[#allocation5 + $0x1a8] sm:$0xff]  }
  0xb8   : > { %1352 = vmatprep.mubr.bf16.mxu1 %v4061_v62  ;;  %3630 = vmatprep.subr.bf16.mxu1 %v4068_v63  ;;  %v4121_v62 = vld [vmem:[%s4545_s5 + $0xe0] ss:$12 sps:$4 sm:$0xff]  }
  0xb9   : > { %3594 = vmatprep.subr.bf16.mxu0 %v4581_v22 }
  0xba   : > { %3595 = vmatpush3.bf16.msra.mxu0 %v4581_v22  ;;  %v4743_v22 = vld [vmem:[%s4545_s5 + $0x154] ss:$12 sps:$4 sm:$0xff]  }
  0xbb   : > { %3631 = vmatpush3.bf16.msra.mxu1 %v4068_v63  ;;  %3444 = vmatprep.subr.bf16.mxu0 %v4102_v8  ;;  %v4123_v63 = vld [vmem:[#allocation5 + $0x1b0] sm:$0xff]   ;;  %v4129_v8 = vld [vmem:[#allocation5 + $0x208] sm:$0xff]  }
  0xbc   : > { %3632 = vmatprep.subr.bf16.mxu1 %v4075_v0 }
  0xbe   : > { %887 = vmatmul.mubr.bf16.gmra.mrb[20].mxu0 %v4676_v1  ;;  %1353 = vmatmul.mubr.bf16.gmra.mrb[20].mxu1 %v4064_v2  ;;  %v4124_v2 = vld [vmem:[#allocation5 + $0x1f8] sm:$0xff]  }
  0xbf   : > { %894 = vmatprep.mubr.bf16.mxu0 %v4681_v3  ;;  %1360 = vmatprep.mubr.bf16.mxu1 %v4585_v23  ;;  %v4750_v23 = vld [vmem:[%s4545_s5 + $0x150] ss:$12 sps:$4 sm:$0xff]  }
  0xc0   : > { %3633 = vmatpush3.bf16.msra.mxu1 %v4075_v0  ;;  %v4126_v0 = vld [vmem:[%s4545_s5 + $0x8] ss:$12 sps:$4 sm:$0xff]  }
  0xc1   : > { %3634 = vmatprep.subr.bf16.mxu1 %v4082_v4 }
  0xc4   : > { %3635 = vmatpush3.bf16.msra.mxu1 %v4082_v4  ;;  %v4125_v4 = vld [vmem:[#allocation5 + $0x1b8] sm:$0xff]  }
  0xc5   : > { %3636 = vmatprep.subr.bf16.mxu1 %v4089_v6 }
  0xc6   : > { %895 = vmatmul.mubr.bf16.gmra.mrb[24].mxu0 %v4687_v5  ;;  %1361 = vmatmul.mubr.bf16.gmra.mrb[24].mxu1 %v4594_v27  ;;  %v4763_v27 = vld [vmem:[%s4545_s5 + $0x184] ss:$12 sps:$4 sm:$0xff]  }
  0xc7   : > { %902 = vmatprep.mubr.bf16.mxu0 %v4690_v7  ;;  %1368 = vmatprep.mubr.bf16.mxu1 %v4603_v31  ;;  %v4780_v31 = vld [vmem:[%s4545_s5 + $0x198] ss:$12 sps:$4 sm:$0xff]  }
  0xc8   : > { %3637 = vmatpush3.bf16.msra.mxu1 %v4089_v6  ;;  %v4127_v6 = vld [vmem:[%s4545_s5 + $0x20] ss:$12 sps:$4 sm:$0xff]  }
  0xc9   : > { %3638 = vmatprep.subr.bf16.mxu1 %v4096_v9 }
  0xcc   : > { %3639 = vmatpush3.bf16.msra.mxu1 %v4096_v9  ;;  %v4130_v9 = vld [vmem:[#allocation5 + $0x210] sm:$0xff]  }
  0xcd   : > { %3640 = vmatprep.subr.bf16.mxu1 %v4104_v10 }
  0xce   : > { %903 = vmatmul.mubr.bf16.gmra.mrb[28].mxu0 %v4697_v11  ;;  %1369 = vmatmul.mubr.bf16.gmra.mrb[28].mxu1 %v4613_v34  ;;  %v4790_v34 = vld [vmem:[%s4545_s5 + $0x50] ss:$12 sps:$4 sm:$0xff]  }
  0xcf   : > { %910 = vmatprep.mubr.bf16.mxu0 %v4700_v12  ;;  %1376 = vmatprep.mubr.bf16.mxu1 %v4621_v39 }
  0xd0   : > { %3641 = vmatpush3.bf16.msra.mxu1 %v4104_v10  ;;  %v4131_v10 = vld [vmem:[#allocation5 + $0x218] sm:$0xff]  }
  0xd1   : > { %3642 = vmatprep.subr.bf16.mxu1 %v4117_v14 }
  0xd4   : > { %3643 = vmatpush3.bf16.msra.mxu1 %v4117_v14 }
  0xd5   : > { %3676 = vmatprep.subr.bf16.mxu1 %v4722_v18 }
  0xd6   : > { %911 = vmatmul.mubr.bf16.gmra.mrb[32].mxu0 %v4707_v13  ;;  %1377 = vmatmul.mubr.bf16.gmra.mrb[32].mxu1 %v4633_v42 }
  0xd7   : > { %918 = vmatprep.mubr.bf16.mxu0 %v4710_v15  ;;  %1384 = vmatprep.mubr.bf16.mxu1 %v4641_v47 }
  0xde   : > { %919 = vmatmul.mubr.bf16.gmra.mrb[36].mxu0 %v4717_v16  ;;  %1385 = vmatmul.mubr.bf16.gmra.mrb[36].mxu1 %v4649_v51 }
  0xdf   : > { %926 = vmatprep.mubr.bf16.mxu0 %v4720_v17  ;;  %1392 = vmatprep.mubr.bf16.mxu1 %v4655_v55 }
  0xe6   : > { %927 = vmatmul.mubr.bf16.gmra.mrb[40].mxu0 %v4730_v19  ;;  %1393 = vmatmul.mubr.bf16.gmra.mrb[40].mxu1 %v4664_v60 }
  0xe7   : > { %934 = vmatprep.mubr.bf16.mxu0 %v4733_v20  ;;  %1400 = vmatprep.mubr.bf16.mxu1 %v4668_v61 }
  0xee   : > { %935 = vmatmul.mubr.bf16.gmra.mrb[44].mxu0 %v4740_v21  ;;  %1401 = vmatmul.mubr.bf16.gmra.mrb[44].mxu1 %v4676_v1 }
  0xef   : > { %942 = vmatprep.mubr.bf16.mxu0 %v4743_v22  ;;  %1408 = vmatprep.mubr.bf16.mxu1 %v4681_v3 }
  0xf6   : > { %943 = vmatmul.mubr.bf16.gmra.mrb[48].mxu0 %v4750_v23  ;;  %1409 = vmatmul.mubr.bf16.gmra.mrb[48].mxu1 %v4687_v5 }
  0xf7   : > { %950 = vmatprep.mubr.bf16.mxu0 %v4753_v25  ;;  %1416 = vmatprep.mubr.bf16.mxu1 %v4690_v7 }
  0xfe   : > { %951 = vmatmul.mubr.bf16.gmra.mrb[52].mxu0 %v4760_v26  ;;  %1417 = vmatmul.mubr.bf16.gmra.mrb[52].mxu1 %v4697_v11 }
  0xff   : > { %958 = vmatprep.mubr.bf16.mxu0 %v4763_v27  ;;  %1424 = vmatprep.mubr.bf16.mxu1 %v4700_v12 }
 0x106   : > { %959 = vmatmul.mubr.bf16.gmra.mrb[56].mxu0 %v4770_v29  ;;  %1425 = vmatmul.mubr.bf16.gmra.mrb[56].mxu1 %v4707_v13 }
 0x107   : > { %966 = vmatprep.mubr.bf16.mxu0 %v4773_v30  ;;  %1432 = vmatprep.mubr.bf16.mxu1 %v4710_v15 }
 0x10e   : > { %967 = vmatmul.mubr.bf16.gmra.mrb[60].mxu0 %v4780_v31  ;;  %1433 = vmatmul.mubr.bf16.gmra.mrb[60].mxu1 %v4717_v16 }
 0x10f   : > { %3596 = vmatprep.mubr.bf16.mxu0 %v4783_v33  ;;  %1440 = vmatprep.mubr.bf16.mxu1 %v4720_v17 }
 0x116   : > { %3597 = vmatmul.mubr.bf16.vlgmr.msra.gmra.mrb[64].mxu0 %v4790_v34  ;;  %1441 = vmatmul.mubr.bf16.gmra.mrb[64].mxu1 %v4730_v19 }
 0x117   : > { %3445 = vmatpush3.bf16.msra.mxu0 %v4103_v35  ;;  %3600 = vmatprep.mubr.bf16.mxu0 %v4793_v37  ;;  %v4141_v35 = vld [vmem:[%s4545_s5 + $0xe0] ss:$12 sps:$4 sm:$0xff]  }
 0x118   : > { %3446 = vmatprep.subr.bf16.mxu0 %v4105_v38  ;;  %1448 = vmatprep.mubr.bf16.mxu1 %v4733_v20 }
 0x11b   : > { %3447 = vmatpush3.bf16.msra.mxu0 %v4106_v41  ;;  %v4142_v41 = vld [vmem:[%s4545_s5 + $0xf8] ss:$12 sps:$4 sm:$0xff]  }
 0x11c   : > { %3448 = vmatprep.subr.bf16.mxu0 %v4109_v44 }
 0x11e   : > { %3601 = vmatmul.mubr.bf16.gmra.mrb[68].mxu0 %v4800_v45  ;;  %1449 = vmatmul.mubr.bf16.gmra.mrb[68].mxu1 %v4740_v21 }
 0x11f   : > { %3449 = vmatpush3.bf16.msra.mxu0 %v4110_v46  ;;  %3604 = vmatprep.mubr.bf16.mxu0 %v4113_v48 }
 0x120   : > { %3450 = vmatprep.subr.bf16.mxu0 %v4111_v49  ;;  %1456 = vmatprep.mubr.bf16.mxu1 %v4743_v22  ;;  %v4143_v49 = vld [vmem:[%s4545_s5 + $0x110] ss:$12 sps:$4 sm:$0xff]  }
 0x123   : > { %3451 = vmatpush3.bf16.msra.mxu0 %v4112_v50 }
 0x124   : > { %3452 = vmatprep.subr.bf16.mxu0 %v4115_v52 }
 0x126   : > { %3605 = vmatmul.mubr.bf16.gmra.mrb[72].mxu0 %v4114_v53  ;;  %1457 = vmatmul.mubr.bf16.gmra.mrb[72].mxu1 %v4750_v23 }
 0x127   : > { %3453 = vmatpush3.bf16.msra.mxu0 %v4116_v54  ;;  %3608 = vmatprep.mubr.bf16.mxu0 %v4120_v56 }
 0x128   : > { %3454 = vmatprep.subr.bf16.mxu0 %v4118_v57  ;;  %1464 = vmatprep.mubr.bf16.mxu1 %v4753_v25 }
 0x12b   : > { %3455 = vmatpush3.bf16.msra.mxu0 %v4119_v58 }
 0x12c   : > { %3456 = vmatprep.subr.bf16.mxu0 %v4122_v59 }
 0x12e   : > { %3609 = vmatmul.mubr.bf16.gmra.mrb[76].mxu0 %v4121_v62  ;;  %1465 = vmatmul.mubr.bf16.gmra.mrb[76].mxu1 %v4760_v26 }
 0x12f   : > { %3457 = vmatpush3.bf16.msra.mxu0 %v4123_v63  ;;  %3644 = vmatprep.mubr.bf16.mxu1 %v4126_v0 }
 0x130   : > { %3458 = vmatprep.subr.bf16.mxu0 %v4124_v2  ;;  %2179 = vmatprep.mubr.bf16.mxu0 %v4621_v39  ;;  %v4132_v39 = vld [vmem:[#allocation5 + $0x220] sm:$0xff]  }
 0x131   : > { %v4145_v2 = vld [vmem:[%s4545_s5 + $0x140] ss:$12 sps:$4 sm:$0xff]  }
 0x133   : > { %3459 = vmatpush3.bf16.msra.mxu0 %v4125_v4 }
 0x136   : > { %3645 = vmatmul.mubr.bf16.vlgmr.msra.gmra.mrb[80].mxu1 %v4127_v6  ;;  %2180 = vmatmul.mubr.bf16.vlgmr.msra.gmra.mrb[80].mxu0 %v4633_v42  ;;  %v4133_v42 = vld [vmem:[#allocation5 + $0x228] sm:$0xff]  }
 0x137   : > { %3677 = vmatpush3.bf16.msra.mxu1 %v4722_v18  ;;  %3648 = vmatprep.mubr.bf16.mxu1 %v4783_v33  ;;  %v4140_v18 = vld [vmem:[%s4545_s5 + $0xc8] ss:$12 sps:$4 sm:$0xff]  }
 0x138   : > { %2187 = vmatprep.mubr.bf16.mxu0 %v4641_v47  ;;  %3678 = vmatprep.subr.bf16.mxu1 %v4129_v8  ;;  %v4134_v47 = vld [vmem:[#allocation5 + $0x230] sm:$0xff]  }
 0x13b   : > { %3679 = vmatpush3.bf16.msra.mxu1 %v4129_v8 }
 0x13c   : > { %3680 = vmatprep.subr.bf16.mxu1 %v4130_v9 }
 0x13e   : > { %3649 = vmatmul.mubr.bf16.gmra.mrb[84].mxu1 %v4790_v34  ;;  %2188 = vmatmul.mubr.bf16.gmra.mrb[84].mxu0 %v4649_v51  ;;  %v4135_v51 = vld [vmem:[#allocation5 + $0x238] sm:$0xff]  }
 0x13f   : > { %3652 = vmatprep.mubr.bf16.mxu1 %v4793_v37  ;;  %2195 = vmatprep.mubr.bf16.mxu0 %v4655_v55 }
 0x140   : > { %3681 = vmatpush3.bf16.msra.mxu1 %v4130_v9 }
 0x141   : > { %3682 = vmatprep.subr.bf16.mxu1 %v4131_v10 }
 0x144   : > { %3683 = vmatpush3.bf16.msra.mxu1 %v4131_v10  ;;  %v4146_v10 = vld [vmem:[%s4545_s5 + $0x158] ss:$12 sps:$4 sm:$0xff]  }
 0x145   : > { %3684 = vmatprep.subr.bf16.mxu1 %v4132_v39 }
 0x146   : > { %3653 = vmatmul.mubr.bf16.gmra.mrb[88].mxu1 %v4800_v45  ;;  %2196 = vmatmul.mubr.bf16.gmra.mrb[88].mxu0 %v4664_v60 }
 0x147   : > { %3656 = vmatprep.mubr.bf16.mxu1 %v4113_v48  ;;  %2203 = vmatprep.mubr.bf16.mxu0 %v4668_v61  ;;  %v4136_v61 = vld [vmem:[%s4545_s5 + $0x68] ss:$12 sps:$4 sm:$0xff]  }
 0x148   : > { %3685 = vmatpush3.bf16.msra.mxu1 %v4132_v39 }
 0x149   : > { %3686 = vmatprep.subr.bf16.mxu1 %v4133_v42 }
 0x14c   : > { %3687 = vmatpush3.bf16.msra.mxu1 %v4133_v42 }
 0x14d   : > { %3688 = vmatprep.subr.bf16.mxu1 %v4134_v47 }
 0x14e   : > { %3657 = vmatmul.mubr.bf16.gmra.mrb[92].mxu1 %v4114_v53  ;;  %2204 = vmatmul.mubr.bf16.gmra.mrb[92].mxu0 %v4676_v1 }
 0x14f   : > { %3660 = vmatprep.mubr.bf16.mxu1 %v4120_v56  ;;  %2211 = vmatprep.mubr.bf16.mxu0 %v4681_v3  ;;  %v4137_v3 = vld [vmem:[%s4545_s5 + $0x80] ss:$12 sps:$4 sm:$0xff]   ;;  %v4144_v56 = vld [vmem:[%s4545_s5 + $0x128] ss:$12 sps:$4 sm:$0xff]  }
 0x150   : > { %3689 = vmatpush3.bf16.msra.mxu1 %v4134_v47 }
 0x151   : > { %3690 = vmatprep.subr.bf16.mxu1 %v4135_v51 }
 0x154   : > { %3691 = vmatpush3.bf16.msra.mxu1 %v4135_v51 }
 0x156   : > { %3661 = vmatmul.mubr.bf16.gmra.mrb[0].mxu1 %v4121_v62  ;;  %2212 = vmatmul.mubr.bf16.gmra.mrb[96].mxu0 %v4687_v5 }
 0x157   : > { %3664 = vmatprep.mubr.bf16.mxu1 %v4588_v24  ;;  %2219 = vmatprep.mubr.bf16.mxu0 %v4690_v7 }
 0x15e   : > { %3665 = vmatmul.mubr.bf16.gmra.mrb[4].mxu1 %v4598_v28  ;;  %2220 = vmatmul.mubr.bf16.gmra.mrb[100].mxu0 %v4697_v11  ;;  %v4138_v11 = vld [vmem:[%s4545_s5 + $0x98] ss:$12 sps:$4 sm:$0xff]  }
 0x15f   : > { %3668 = vmatprep.mubr.bf16.mxu1 %v4606_v32  ;;  %2227 = vmatprep.mubr.bf16.mxu0 %v4700_v12 }
 0x166   : > { %3669 = vmatmul.mubr.bf16.gmra.mrb[8].mxu1 %v4617_v36  ;;  %2228 = vmatmul.mubr.bf16.gmra.mrb[104].mxu0 %v4707_v13 }
 0x167   : > { %3672 = vmatprep.mubr.bf16.mxu1 %v4625_v40  ;;  %2235 = vmatprep.mubr.bf16.mxu0 %v4710_v15  ;;  %v4139_v15 = vld [vmem:[%s4545_s5 + $0xb0] ss:$12 sps:$4 sm:$0xff]  }
 0x169   : > { %v3188_v24 = vpop.f32.mrb[0].mxu0 }
 0x16a   : > { %v3189_v55 = vpop.f32.mrb[1].mxu0 }
 0x16b   : > { %v4839_v60 = vadd.f32 %v3189_v55, %v3188_v24  ;;  %v3191_v28 = vpop.f32.mrb[2].mxu0 }
 0x16c   : > { %v3192_v1 = vpop.f32.mrb[3].mxu0 }
 0x16d   : > { %v4842_v32 = vadd.f32 %v3192_v1, %v3191_v28  ;;  %v4147_v28 = vld [vmem:[%s4545_s5 + $0x170] ss:$12 sps:$4 sm:$0xff]  }
 0x16e   : > { %3673 = vmatmul.mubr.bf16.gmra.mrb[12].mxu1 %v4636_v43  ;;  %2236 = vmatmul.mubr.bf16.gmra.mrb[108].mxu0 %v4717_v16 }
 0x16f   : > { %2243 = vmatprep.mubr.bf16.mxu0 %v4720_v17  ;;  %3692 = vmatprep.mubr.bf16.mxu1 %v4136_v61 }
 0x171   : > { %v3194_v36 = vpop.f32.mrb[4].mxu0 }
 0x172   : > { %v3195_v40 = vpop.f32.mrb[5].mxu0 }
 0x173   : > { %v4848_v5 = vadd.f32 %v3195_v40, %v3194_v36  ;;  %v3197_v7 = vpop.f32.mrb[6].mxu0 }
 0x174   : > { %v3198_v12 = vpop.f32.mrb[7].mxu0 }
 0x175   : > { %v4851_v13 = vadd.f32 %v3198_v12, %v3197_v7  ;;  %v4150_v7 = vld [vmem:[%s4545_s5 + $0x188] ss:$12 sps:$4 sm:$0xff]  }
 0x176   : > { %2244 = vmatmul.mubr.bf16.gmra.mrb[112].mxu0 %v4730_v19  ;;  %3693 = vmatmul.mubr.bf16.vlgmr.msra.gmra.mrb[80].mxu1 %v4137_v3  ;;  %v4148_v3 = vld [vmem:[%s4545_s5 + $0x1b4] ss:$12 sps:$4 sm:$0xff]  }
 0x177   : > { %2251 = vmatprep.mubr.bf16.mxu0 %v4733_v20  ;;  %3696 = vmatprep.mubr.bf16.mxu1 %v4138_v11 }
 0x179   : > { %v3200_v43 = vpop.f32.mrb[8].mxu0 }
 0x17a   : > { %v3201_v14 = vpop.f32.mrb[9].mxu0 }
 0x17b   : > { %v4856_v16 = vadd.f32 %v3201_v14, %v3200_v43  ;;  %v3203_v17 = vpop.f32.mrb[10].mxu0 }
 0x17c   : > { %v3204_v33 = vpop.f32.mrb[11].mxu0 }
 0x17d   : > { %v4859_v34 = vadd.f32 %v3204_v33, %v3203_v17  ;;  %v4152_v33 = vld [vmem:[%s4545_s5 + $0x1a0] ss:$12 sps:$4 sm:$0xff]  }
 0x17e   : > { %2252 = vmatmul.mubr.bf16.gmra.mrb[116].mxu0 %v4740_v21  ;;  %3697 = vmatmul.mubr.bf16.gmra.mrb[84].mxu1 %v4139_v15 }
 0x17f   : > { %2259 = vmatprep.mubr.bf16.mxu0 %v4743_v22  ;;  %3700 = vmatprep.mubr.bf16.mxu1 %v4140_v18  ;;  %v4151_v18 = vld [vmem:[%s4545_s5 + $0x1b0] ss:$12 sps:$4 sm:$0xff]  }
 0x181   : > { %v3206_v19 = vpop.f32.mrb[12].mxu0 }
 0x182   : > { %v3207_v20 = vpop.f32.mrb[13].mxu0 }
 0x183   : > { %v4864_v37 = vadd.f32 %v3207_v20, %v3206_v19  ;;  %v3209_v38 = vpop.f32.mrb[14].mxu0 }
 0x184   : > { %v3210_v44 = vpop.f32.mrb[15].mxu0 }
 0x185   : > { %v4867_v45 = vadd.f32 %v3210_v44, %v3209_v38  ;;  %v4155_v44 = vld [vmem:[%s4545_s5 + $0x1b8] ss:$12 sps:$4 sm:$0xff]  }
 0x186   : > { %2260 = vmatmul.mubr.bf16.gmra.mrb[120].mxu0 %v4750_v23  ;;  %3701 = vmatmul.mubr.bf16.gmra.mrb[88].mxu1 %v4141_v35 }
 0x187   : > { %2267 = vmatprep.mubr.bf16.mxu0 %v4753_v25  ;;  %3704 = vmatprep.mubr.bf16.mxu1 %v4142_v41  ;;  %v4153_v41 = vld [vmem:[%s4545_s5 + $0x1cc] ss:$12 sps:$4 sm:$0xff]  }
 0x189   : > { %v3212_v21 = vpop.f32.mrb[16].mxu0  ;;  %v3324_v22 = vpop.f32.mrb[16].mxu1 }
 0x18a   : > { %v3213_v46 = vpop.f32.mrb[17].mxu0  ;;  %v3325_v48 = vpop.f32.mrb[17].mxu1 }
 0x18b   : > { %v4872_v50 = vadd.f32 %v3213_v46, %v3212_v21  ;;  %v3215_v52 = vpop.f32.mrb[18].mxu0  ;;  %v4874_v53 = vadd.f32 %v3325_v48, %v3324_v22  ;;  %v3327_v54 = vpop.f32.mrb[18].mxu1 }
 0x18c   : > { %v3216_v57 = vpop.f32.mrb[19].mxu0  ;;  %v3328_v58 = vpop.f32.mrb[19].mxu1 }
 0x18d   : > { %v4877_v23 = vadd.f32 %v3216_v57, %v3215_v52  ;;  %v4879_v25 = vadd.f32 %v3328_v58, %v3327_v54  ;;  %v4157_v57 = vld [vmem:[%s4545_s5 + $0x1d0] ss:$12 sps:$4 sm:$0xff]  }
 0x18e   : > { %2268 = vmatmul.mubr.bf16.gmra.mrb[124].mxu0 %v4760_v26  ;;  %3705 = vmatmul.mubr.bf16.gmra.mrb[92].mxu1 %v4143_v49 }
 0x18f   : > { %2275 = vmatprep.mubr.bf16.mxu0 %v4763_v27  ;;  %3708 = vmatprep.mubr.bf16.mxu1 %v4144_v56  ;;  %v4156_v56 = vld [vmem:[%s4545_s5 + $0x1c8] ss:$12 sps:$4 sm:$0xff]  }
 0x191   : > { %v3218_v59 = vpop.f32.mrb[20].mxu0  ;;  %v3330_v62 = vpop.f32.mrb[20].mxu1 }
 0x192   : > { %v3219_v63 = vpop.f32.mrb[21].mxu0  ;;  %v3331_v0 = vpop.f32.mrb[21].mxu1 }
 0x193   : > { %v4884_v4 = vadd.f32 %v3219_v63, %v3218_v59  ;;  %v3221_v6 = vpop.f32.mrb[22].mxu0  ;;  %v4886_v8 = vadd.f32 %v3331_v0, %v3330_v62  ;;  %v3333_v9 = vpop.f32.mrb[22].mxu1 }
 0x194   : > { %v3222_v39 = vpop.f32.mrb[23].mxu0  ;;  %v3334_v42 = vpop.f32.mrb[23].mxu1 }
 0x195   : > { %v4889_v26 = vadd.f32 %v3222_v39, %v3221_v6  ;;  %v4891_v27 = vadd.f32 %v3334_v42, %v3333_v9 }
 0x196   : > { %2276 = vmatmul.mubr.bf16.gmra.mrb[128].mxu0 %v4770_v29  ;;  %3709 = vmatmul.mubr.bf16.gmra.mrb[0].mxu1 %v4145_v2 }
 0x197   : > { %2283 = vmatprep.mubr.bf16.mxu0 %v4773_v30  ;;  %3712 = vmatprep.mubr.bf16.mxu1 %v4146_v10 }
 0x199   : > { %v3224_v47 = vpop.f32.mrb[24].mxu0  ;;  %v3336_v51 = vpop.f32.mrb[24].mxu1 }
 0x19a   : > { %v3225_v24 = vpop.f32.mrb[25].mxu0  ;;  %v3337_v55 = vpop.f32.mrb[25].mxu1 }
 0x19b   : > { %v4896_v61 = vadd.f32 %v3225_v24, %v3224_v47  ;;  %v3227_v1 = vpop.f32.mrb[26].mxu0  ;;  %v4898_v36 = vadd.f32 %v3337_v55, %v3336_v51  ;;  %v3339_v40 = vpop.f32.mrb[26].mxu1 }
 0x19c   : > { %v3228_v29 = vpop.f32.mrb[27].mxu0  ;;  %v3340_v11 = vpop.f32.mrb[27].mxu1 }
 0x19d   : > { %v4902_v12 = vadd.f32 %v3228_v29, %v3227_v1  ;;  %v4904_v30 = vadd.f32 %v3340_v11, %v3339_v40 }
 0x19e   : > { %2284 = vmatmul.mubr.bf16.gmra.mrb[132].mxu0 %v4780_v31  ;;  %3713 = vmatmul.mubr.bf16.gmra.mrb[4].mxu1 %v4147_v28 }
 0x19f   : > { %2291 = vmatprep.mubr.bf16.mxu0 %v4148_v3  ;;  %3716 = vmatprep.mubr.bf16.mxu1 %v4150_v7 }
 0x1a1   : > { %v3230_v43 = vpop.f32.mrb[28].mxu0  ;;  %v3342_v14 = vpop.f32.mrb[28].mxu1 }
 0x1a2   : > { %v3231_v15 = vpop.f32.mrb[29].mxu0  ;;  %v3343_v17 = vpop.f32.mrb[29].mxu1 }
 0x1a3   : > { %v4909_v19 = vadd.f32 %v3231_v15, %v3230_v43  ;;  %v3233_v20 = vpop.f32.mrb[30].mxu0  ;;  %v4911_v35 = vadd.f32 %v3343_v17, %v3342_v14  ;;  %v3345_v38 = vpop.f32.mrb[30].mxu1 }
 0x1a4   : > { %v3234_v31 = vpop.f32.mrb[31].mxu0  ;;  %v3346_v21 = vpop.f32.mrb[31].mxu1 }
 0x1a5   : > { %v4915_v22 = vadd.f32 %v3234_v31, %v3233_v20  ;;  %v4917_v46 = vadd.f32 %v3346_v21, %v3345_v38 }
 0x1a6   : > { %2292 = vmatmul.mubr.bf16.gmra.mrb[136].mxu0 %v4151_v18  ;;  %3717 = vmatmul.mubr.bf16.gmra.mrb[8].mxu1 %v4152_v33 }
 0x1a7   : > { %2299 = vmatprep.mubr.bf16.mxu0 %v4153_v41  ;;  %3720 = vmatprep.mubr.bf16.mxu1 %v4155_v44 }
 0x1a9   : > { %v3236_v48 = vpop.f32.mrb[32].mxu0  ;;  %v3348_v49 = vpop.f32.mrb[32].mxu1 }
 0x1aa   : > { %v3237_v52 = vpop.f32.mrb[33].mxu0  ;;  %v3349_v54 = vpop.f32.mrb[33].mxu1 }
 0x1ab   : > { %v3238_v58 = vadd.f32 %v3237_v52, %v3236_v48  ;;  %v3239_v59 = vpop.f32.mrb[34].mxu0  ;;  %v4921_v62 = vadd.f32 %v3349_v54, %v3348_v49  ;;  %v3351_v63 = vpop.f32.mrb[34].mxu1 }
 0x1ac   : > { %v3240_v0 = vpop.f32.mrb[35].mxu0  ;;  %v3352_v2 = vpop.f32.mrb[35].mxu1 }
 0x1ad   : > { %v3241_v6 = vadd.f32 %v3240_v0, %v3239_v59  ;;  %v4923_v9 = vadd.f32 %v3352_v2, %v3351_v63 }
 0x1ae   : > { %2300 = vmatmul.mubr.bf16.gmra.mrb[140].mxu0 %v4156_v56  ;;  %3721 = vmatmul.mubr.bf16.gmra.mrb[12].mxu1 %v4157_v57 }
 0x1b1   : > { %v3242_v10 = vpop.f32.mrb[36].mxu0  ;;  %v3354_v39 = vpop.f32.mrb[36].mxu1 }
 0x1b2   : > { %v3243_v42 = vpop.f32.mrb[37].mxu0  ;;  %v3355_v47 = vpop.f32.mrb[37].mxu1 }
 0x1b3   : > { %v3244_v51 = vadd.f32 %v3243_v42, %v3242_v10  ;;  %v3245_v24 = vpop.f32.mrb[38].mxu0  ;;  %v4925_v55 = vadd.f32 %v3355_v47, %v3354_v39  ;;  %v3357_v28 = vpop.f32.mrb[38].mxu1 }
 0x1b4   : > { %v3246_v1 = vpop.f32.mrb[39].mxu0  ;;  %v3358_v40 = vpop.f32.mrb[39].mxu1 }
 0x1b5   : > { %v3247_v3 = vadd.f32 %v3246_v1, %v3245_v24  ;;  %v4927_v7 = vadd.f32 %v3358_v40, %v3357_v28 }
 0x1b9   : > { %v3248_v29 = vpop.f32.mrb[40].mxu0  ;;  %v3360_v11 = vpop.f32.mrb[40].mxu1 }
 0x1ba   : > { %v3249_v43 = vpop.f32.mrb[41].mxu0  ;;  %v3361_v14 = vpop.f32.mrb[41].mxu1 }
 0x1bb   : > { %v3250_v15 = vadd.f32 %v3249_v43, %v3248_v29  ;;  %v3251_v17 = vpop.f32.mrb[42].mxu0  ;;  %v4929_v18 = vadd.f32 %v3361_v14, %v3360_v11  ;;  %v3363_v33 = vpop.f32.mrb[42].mxu1 }
 0x1bc   : > { %v3252_v20 = vpop.f32.mrb[43].mxu0  ;;  %v3364_v38 = vpop.f32.mrb[43].mxu1 }
 0x1bd   : > { %v3253_v41 = vadd.f32 %v3252_v20, %v3251_v17  ;;  %v4931_v44 = vadd.f32 %v3364_v38, %v3363_v33 }
 0x1c1   : > { %v3254_v31 = vpop.f32.mrb[44].mxu0  ;;  %v3366_v21 = vpop.f32.mrb[44].mxu1 }
 0x1c2   : > { %v3255_v48 = vpop.f32.mrb[45].mxu0  ;;  %v3367_v49 = vpop.f32.mrb[45].mxu1 }
 0x1c3   : > { %v3256_v52 = vadd.f32 %v3255_v48, %v3254_v31  ;;  %v3257_v54 = vpop.f32.mrb[46].mxu0  ;;  %v4933_v56 = vadd.f32 %v3367_v49, %v3366_v21  ;;  %v3369_v57 = vpop.f32.mrb[46].mxu1 }
 0x1c4   : > { %v3258_v59 = vpop.f32.mrb[47].mxu0  ;;  %v3370_v63 = vpop.f32.mrb[47].mxu1 }
 0x1c5   : > { %v3259_v0 = vadd.f32 %v3258_v59, %v3257_v54  ;;  %v4935_v2 = vadd.f32 %v3370_v63, %v3369_v57 }
 0x1c9   : > { %v3260_v10 = vpop.f32.mrb[48].mxu0  ;;  %v3372_v39 = vpop.f32.mrb[48].mxu1 }
 0x1ca   : > { %v3261_v42 = vpop.f32.mrb[49].mxu0  ;;  %v3373_v47 = vpop.f32.mrb[49].mxu1 }
 0x1cb   : > { %v4937_v24 = vadd.f32 %v3261_v42, %v3260_v10  ;;  %v3374_v28 = vadd.f32 %v3373_v47, %v3372_v39  ;;  %v3263_v1 = vpop.f32.mrb[50].mxu0  ;;  %v3375_v40 = vpop.f32.mrb[50].mxu1 }
 0x1cc   : > { %v3264_v29 = vpop.f32.mrb[51].mxu0  ;;  %v3376_v11 = vpop.f32.mrb[51].mxu1 }
 0x1cd   : > { %v4939_v43 = vadd.f32 %v3374_v28, %v3238_v58  ;;  %v4941_v14 = vadd.f32 %v3264_v29, %v3263_v1  ;;  %v3377_v17 = vadd.f32 %v3376_v11, %v3375_v40 }
 0x1cf   : > { %v4943_v33 = vadd.f32 %v3377_v17, %v3241_v6 }
 0x1d1   : > { %v3266_v20 = vpop.f32.mrb[52].mxu0  ;;  %v3378_v38 = vpop.f32.mrb[52].mxu1 }
 0x1d2   : > { %v3267_v31 = vpop.f32.mrb[53].mxu0  ;;  %v3379_v21 = vpop.f32.mrb[53].mxu1 }
 0x1d3   : > { %v4945_v48 = vadd.f32 %v3267_v31, %v3266_v20  ;;  %v3380_v49 = vadd.f32 %v3379_v21, %v3378_v38  ;;  %v3269_v54 = vpop.f32.mrb[54].mxu0  ;;  %v3381_v57 = vpop.f32.mrb[54].mxu1 }
 0x1d4   : > { %v3270_v59 = vpop.f32.mrb[55].mxu0  ;;  %v3382_v63 = vpop.f32.mrb[55].mxu1 }
 0x1d5   : > { %v4947_v10 = vadd.f32 %v3380_v49, %v3244_v51  ;;  %v4949_v58 = vadd.f32 %v3270_v59, %v3269_v54  ;;  %v3383_v39 = vadd.f32 %v3382_v63, %v3381_v57 }
 0x1d7   : > { %v4951_v42 = vadd.f32 %v3383_v39, %v3247_v3 }
 0x1d9   : > { %5259 = vst [vmem:[#allocation12_spill] sm:$0xff] %v4951_v42  ;;  %v3272_v6 = vpop.f32.mrb[56].mxu0  ;;  %v3384_v47 = vpop.f32.mrb[56].mxu1 }
 0x1da   : > { %v3273_v28 = vpop.f32.mrb[57].mxu0  ;;  %v3385_v1 = vpop.f32.mrb[57].mxu1 }
 0x1db   : > { %v4953_v40 = vadd.f32 %v3273_v28, %v3272_v6  ;;  %v3386_v29 = vadd.f32 %v3385_v1, %v3384_v47  ;;  %v3275_v11 = vpop.f32.mrb[58].mxu0  ;;  %v3387_v17 = vpop.f32.mrb[58].mxu1 }
 0x1dc   : > { %v3276_v20 = vpop.f32.mrb[59].mxu0  ;;  %v3388_v38 = vpop.f32.mrb[59].mxu1 }
 0x1dd   : > { %v4955_v31 = vadd.f32 %v3386_v29, %v3250_v15  ;;  %v4957_v51 = vadd.f32 %v3276_v20, %v3275_v11  ;;  %v3389_v21 = vadd.f32 %v3388_v38, %v3387_v17 }
 0x1df   : > { %v4959_v49 = vadd.f32 %v3389_v21, %v3253_v41 }
 0x1e1   : > { %5260 = vst [vmem:[#allocation13_spill] sm:$0xff] %v4959_v49  ;;  %v3278_v3 = vpop.f32.mrb[60].mxu0  ;;  %v3390_v54 = vpop.f32.mrb[60].mxu1 }
 0x1e2   : > { %v3279_v57 = vpop.f32.mrb[61].mxu0  ;;  %v3391_v59 = vpop.f32.mrb[61].mxu1 }
 0x1e3   : > { %v4961_v63 = vadd.f32 %v3279_v57, %v3278_v3  ;;  %v3392_v39 = vadd.f32 %v3391_v59, %v3390_v54  ;;  %v3281_v6 = vpop.f32.mrb[62].mxu0  ;;  %v3393_v47 = vpop.f32.mrb[62].mxu1 }
 0x1e4   : > { %v3282_v28 = vpop.f32.mrb[63].mxu0  ;;  %v3394_v1 = vpop.f32.mrb[63].mxu1 }
 0x1e5   : > { %v4963_v42 = vadd.f32 %v3392_v39, %v3256_v52  ;;  %v4965_v15 = vadd.f32 %v3282_v28, %v3281_v6  ;;  %v3395_v29 = vadd.f32 %v3394_v1, %v3393_v47 }
 0x1e7   : > { %v4967_v11 = vadd.f32 %v3395_v29, %v3259_v0 }
 0x1e9   : > { %v3598_v41 = vpop.f32.mrb[64].mxu0  ;;  %v3396_v17 = vpop.f32.mrb[64].mxu1 }
 0x1ea   : > { %v1018_v20 = vadd.f32 %v3598_v41, %v4848_v5  ;;  %v1009_v38 = vpop.f32.mrb[65].mxu0  ;;  %v3397_v21 = vpop.f32.mrb[65].mxu1 }
 0x1eb   : > { %v1010_v3 = vadd.f32 %v4839_v60, %v1009_v38  ;;  %v3398_v54 = vadd.f32 %v3397_v21, %v3396_v17  ;;  %v3599_v57 = vpop.f32.mrb[66].mxu0  ;;  %v3399_v59 = vpop.f32.mrb[66].mxu1 }
 0x1ec   : > { %v4972_v49 = vadd.f32 %v4886_v8, %v1018_v20  ;;  %v1021_v52 = vadd.f32 %v3599_v57, %v4851_v13  ;;  %v1012_v39 = vpop.f32.mrb[67].mxu0  ;;  %v3400_v6 = vpop.f32.mrb[67].mxu1 }
 0x1ed   : > { %v4976_v0 = vadd.f32 %v4874_v53, %v1010_v3  ;;  %v4979_v47 = vadd.f32 %v3398_v54, %v4937_v24  ;;  %v1013_v5 = vadd.f32 %v4842_v32, %v1012_v39  ;;  %v3401_v28 = vadd.f32 %v3400_v6, %v3399_v59 }
 0x1ee   : > { %v4983_v60 = vadd.f32 %v4891_v27, %v1021_v52 }
 0x1ef   : > { %v4986_v1 = vadd.f32 %v4879_v25, %v1013_v5  ;;  %v4989_v8 = vadd.f32 %v3401_v28, %v4941_v14 }
 0x1f1   : > { %v3602_v13 = vpop.f32.mrb[68].mxu0  ;;  %v3402_v29 = vpop.f32.mrb[68].mxu1 }
 0x1f2   : > { %v1034_v53 = vadd.f32 %v3602_v13, %v4864_v37  ;;  %v1025_v41 = vpop.f32.mrb[69].mxu0  ;;  %v3403_v17 = vpop.f32.mrb[69].mxu1 }
 0x1f3   : > { %v1026_v24 = vadd.f32 %v4856_v16, %v1025_v41  ;;  %v3404_v20 = vadd.f32 %v3403_v17, %v3402_v29  ;;  %v3603_v32 = vpop.f32.mrb[70].mxu0  ;;  %v3405_v38 = vpop.f32.mrb[70].mxu1 }
 0x1f4   : > { %v4994_v27 = vadd.f32 %v4911_v35, %v1034_v53  ;;  %v1037_v25 = vadd.f32 %v3603_v32, %v4867_v45  ;;  %v1028_v21 = vpop.f32.mrb[71].mxu0  ;;  %v3406_v3 = vpop.f32.mrb[71].mxu1 }
 0x1f5   : > { %v4998_v14 = vadd.f32 %v4898_v36, %v1026_v24  ;;  %v5001_v54 = vadd.f32 %v3404_v20, %v4945_v48  ;;  %v1029_v37 = vadd.f32 %v4859_v34, %v1028_v21  ;;  %v3407_v57 = vadd.f32 %v3406_v3, %v3405_v38 }
 0x1f6   : > { %v5005_v16 = vadd.f32 %v4917_v46, %v1037_v25 }
 0x1f7   : > { %v5008_v59 = vadd.f32 %v4904_v30, %v1029_v37  ;;  %v5011_v35 = vadd.f32 %v3407_v57, %v4949_v58 }
 0x1f9   : > { %v3606_v45 = vpop.f32.mrb[72].mxu0  ;;  %v3408_v52 = vpop.f32.mrb[72].mxu1 }
 0x1fa   : > { %v1050_v36 = vadd.f32 %v3606_v45, %v4884_v4  ;;  %v1041_v39 = vpop.f32.mrb[73].mxu0  ;;  %v3409_v6 = vpop.f32.mrb[73].mxu1 }
 0x1fb   : > { %v1042_v48 = vadd.f32 %v4872_v50, %v1041_v39  ;;  %v3410_v5 = vadd.f32 %v3409_v6, %v3408_v52  ;;  %v3607_v34 = vpop.f32.mrb[74].mxu0  ;;  %v3411_v28 = vpop.f32.mrb[74].mxu1 }
 0x1fc   : > { %v5016_v46 = vadd.f32 %v4925_v55, %v1050_v36  ;;  %v1053_v30 = vadd.f32 %v3607_v34, %v4889_v26  ;;  %v1044_v13 = vpop.f32.mrb[75].mxu0  ;;  %v3412_v29 = vpop.f32.mrb[75].mxu1 }
 0x1fd   : > { %v5020_v58 = vadd.f32 %v4921_v62, %v1042_v48  ;;  %v5023_v53 = vadd.f32 %v3410_v5, %v4953_v40  ;;  %v1045_v4 = vadd.f32 %v4877_v23, %v1044_v13  ;;  %v3413_v41 = vadd.f32 %v3412_v29, %v3411_v28 }
 0x1fe   : > { %v5027_v50 = vadd.f32 %v4927_v7, %v1053_v30 }
 0x1ff   : > { %v1382_v17 = vadd.f32 %v4923_v9, %v1045_v4  ;;  %v5031_v55 = vadd.f32 %v3413_v41, %v4957_v51 }
 0x201   : > { %v3610_v26 = vpop.f32.mrb[76].mxu0  ;;  %v3414_v24 = vpop.f32.mrb[76].mxu1 }
 0x202   : > { %v1066_v20 = vadd.f32 %v3610_v26, %v4909_v19  ;;  %v1057_v62 = vpop.f32.mrb[77].mxu0  ;;  %v3415_v32 = vpop.f32.mrb[77].mxu1 }
 0x203   : > { %v1058_v40 = vadd.f32 %v4896_v61, %v1057_v62  ;;  %v3416_v38 = vadd.f32 %v3415_v32, %v3414_v24  ;;  %v3611_v25 = vpop.f32.mrb[78].mxu0  ;;  %v3417_v23 = vpop.f32.mrb[78].mxu1 }
 0x204   : > { %v5036_v21 = vadd.f32 %v4933_v56, %v1066_v20  ;;  %v1069_v7 = vadd.f32 %v3611_v25, %v4915_v22  ;;  %v1060_v9 = vpop.f32.mrb[79].mxu0  ;;  %v3418_v3 = vpop.f32.mrb[79].mxu1 }
 0x205   : > { %v1395_v51 = vadd.f32 %v4929_v18, %v1058_v40  ;;  %v5041_v37 = vadd.f32 %v3416_v38, %v4961_v63  ;;  %v1061_v19 = vadd.f32 %v4902_v12, %v1060_v9  ;;  %v3419_v57 = vadd.f32 %v3418_v3, %v3417_v23 }
 0x206   : > { %v5045_v61 = vadd.f32 %v4935_v2, %v1069_v7 }
 0x207   : > { %v1398_v45 = vadd.f32 %v4931_v44, %v1061_v19  ;;  %v5049_v56 = vadd.f32 %v3419_v57, %v4965_v15 }
 0x209   : > { %v3460_v52 = vpop.f32.mrb[80].mxu0 }
 0x20a   : > { %v3461_v22 = vpop.f32.mrb[81].mxu0 }
 0x20b   : > { %v3462_v36 = vadd.f32 %v3461_v22, %v3460_v52  ;;  %v3463_v39 = vpop.f32.mrb[82].mxu0 }
 0x20c   : > { %v3464_v6 = vpop.f32.mrb[83].mxu0 }
 0x20d   : > { %v3465_v18 = vadd.f32 %v3464_v6, %v3463_v39  ;;  %v5052_v63 = vadd.f32 %v3462_v36, %v4976_v0 }
 0x20f   : > { %v5055_v12 = vadd.f32 %v3465_v18, %v4986_v1 }
 0x211   : > { %v3466_v48 = vpop.f32.mrb[84].mxu0 }
 0x212   : > { %v3467_v2 = vpop.f32.mrb[85].mxu0 }
 0x213   : > { %v3468_v5 = vadd.f32 %v3467_v2, %v3466_v48  ;;  %v3469_v34 = vpop.f32.mrb[86].mxu0 }
 0x214   : > { %v3470_v44 = vpop.f32.mrb[87].mxu0 }
 0x215   : > { %v3471_v28 = vadd.f32 %v3470_v44, %v3469_v34  ;;  %v3742_v15 = vadd.f32 %v3468_v5, %v4972_v49 }
 0x217   : > { %v3750_v30 = vadd.f32 %v3471_v28, %v4983_v60 }
 0x219   : > { %v3472_v13 = vpop.f32.mrb[88].mxu0 }
 0x21a   : > { %v3473_v29 = vpop.f32.mrb[89].mxu0 }
 0x21b   : > { %v3474_v4 = vadd.f32 %v3473_v29, %v3472_v13  ;;  %v3475_v41 = vpop.f32.mrb[90].mxu0 }
 0x21c   : > { %v3476_v26 = vpop.f32.mrb[91].mxu0 }
 0x21d   : > { %v3477_v0 = vadd.f32 %v3476_v26, %v3475_v41  ;;  %v5060_v24 = vadd.f32 %v3474_v4, %v4998_v14 }
 0x21f   : > { %v5063_v1 = vadd.f32 %v3477_v0, %v5008_v59 }
 0x221   : > { %v3478_v20 = vpop.f32.mrb[92].mxu0 }
 0x222   : > { %v3479_v62 = vpop.f32.mrb[93].mxu0 }
 0x223   : > { %v3480_v32 = vadd.f32 %v3479_v62, %v3478_v20  ;;  %v3481_v40 = vpop.f32.mrb[94].mxu0 }
 0x224   : > { %v3482_v38 = vpop.f32.mrb[95].mxu0 }
 0x225   : > { %v3483_v49 = vadd.f32 %v3482_v38, %v3481_v40  ;;  %v3758_v60 = vadd.f32 %v3480_v32, %v4994_v27 }
 0x227   : > { %v5067_v25 = vadd.f32 %v3483_v49, %v5005_v16 }
 0x229   : > { %v3484_v23 = vpop.f32.mrb[96].mxu0 }
 0x22a   : > { %v3485_v7 = vpop.f32.mrb[97].mxu0 }
 0x22b   : > { %v3486_v9 = vadd.f32 %v3485_v7, %v3484_v23  ;;  %v3487_v3 = vpop.f32.mrb[98].mxu0 }
 0x22c   : > { %v3488_v14 = vpop.f32.mrb[99].mxu0 }
 0x22d   : > { %v3489_v19 = vadd.f32 %v3488_v14, %v3487_v3  ;;  %v5070_v59 = vadd.f32 %v3486_v9, %v5020_v58 }
 0x22f   : > { %v5072_v57 = vadd.f32 %v3489_v19, %v1382_v17 }
 0x231   : > { %v3490_v52 = vpop.f32.mrb[100].mxu0 }
 0x232   : > { %v3491_v22 = vpop.f32.mrb[101].mxu0 }
 0x233   : > { %v3492_v36 = vadd.f32 %v3491_v22, %v3490_v52  ;;  %v3493_v39 = vpop.f32.mrb[102].mxu0 }
 0x234   : > { %v3494_v6 = vpop.f32.mrb[103].mxu0 }
 0x235   : > { %v3495_v27 = vadd.f32 %v3494_v6, %v3493_v39  ;;  %v5075_v16 = vadd.f32 %v3492_v36, %v5016_v46 }
 0x237   : > { %v5078_v18 = vadd.f32 %v3495_v27, %v5027_v50 }
 0x239   : > { %v3496_v48 = vpop.f32.mrb[104].mxu0 }
 0x23a   : > { %v3497_v2 = vpop.f32.mrb[105].mxu0 }
 0x23b   : > { %v3498_v5 = vadd.f32 %v3497_v2, %v3496_v48  ;;  %v3499_v34 = vpop.f32.mrb[106].mxu0 }
 0x23c   : > { %v3500_v58 = vpop.f32.mrb[107].mxu0 }
 0x23d   : > { %v3501_v44 = vadd.f32 %v3500_v58, %v3499_v34  ;;  %v5080_v17 = vadd.f32 %v3498_v5, %v1395_v51 }
 0x23f   : > { %v5082_v28 = vadd.f32 %v3501_v44, %v1398_v45  ;;  %v5090_v45 = vld [vmem:[#allocation7] ss:$0 sm:$0xff] }
 0x241   : > { %v3502_v13 = vpop.f32.mrb[108].mxu0 }
 0x242   : > { %v3503_v29 = vpop.f32.mrb[109].mxu0 }
 0x243   : > { %v3504_v4 = vadd.f32 %v3503_v29, %v3502_v13  ;;  %v3505_v41 = vpop.f32.mrb[110].mxu0 }
 0x244   : > { %v3506_v46 = vpop.f32.mrb[111].mxu0 }
 0x245   : > { %v3507_v26 = vadd.f32 %v3506_v46, %v3505_v41  ;;  %v5085_v50 = vadd.f32 %v3504_v4, %v5036_v21 }
 0x247   : > { %v5088_v0 = vadd.f32 %v3507_v26, %v5045_v61 }
 0x249   : > { %v3508_v20 = vpop.f32.mrb[112].mxu0  ;;  %v3694_v62 = vpop.f32.mrb[80].mxu1 }
 0x24a   : > { %v3743_v32 = vadd.f32 %v3742_v15, %v3694_v62  ;;  %v3509_v51 = vpop.f32.mrb[113].mxu0  ;;  %v2342_v40 = vpop.f32.mrb[81].mxu1 }
 0x24b   : > { %v3510_v38 = vadd.f32 %v3509_v51, %v3508_v20  ;;  %v3747_v49 = vadd.f32 %v5052_v63, %v2342_v40  ;;  %v3511_v23 = vpop.f32.mrb[114].mxu0  ;;  %v3695_v7 = vpop.f32.mrb[82].mxu1  ;;  %v5261_v20 = vld [vmem:[#allocation12_spill] sm:$0xff] }
 0x24c   : > { %v3751_v9 = vadd.f32 %v3750_v30, %v3695_v7  ;;  %v3512_v3 = vpop.f32.mrb[115].mxu0  ;;  %v2345_v21 = vpop.f32.mrb[83].mxu1  ;;  %v2510_v15 = vadd.f32 %v3743_v32, %v5090_v45 }
 0x24d   : > { %v3513_v14 = vadd.f32 %v3512_v3, %v3511_v23  ;;  %v3755_v61 = vadd.f32 %v5055_v12, %v2345_v21  ;;  %v5096_v19 = vadd.f32 %v4939_v43, %v3510_v38  ;;  %v2508_v22 = vadd.f32 %v3747_v49, %v5090_v45 }
 0x24e   : > { %v2511_v52 = vadd.f32 %v3751_v9, %v5090_v45 }
 0x24f   : > { %v2509_v63 = vadd.f32 %v3755_v61, %v5090_v45  ;;  %v5103_v36 = vadd.f32 %v4943_v33, %v3513_v14 }
 0x250   : > { %v3085_v30 = vpack.c.bf16 %v2511_v52, %v2510_v15 }
 0x251   : > { %v3080_v39 = vpack.c.bf16 %v2509_v63, %v2508_v22  ;;  %v3514_v6 = vpop.f32.mrb[116].mxu0  ;;  %v3698_v27 = vpop.f32.mrb[84].mxu1 }
 0x252   : > { %3157 = vst [vmem:[%s5105_s22 + $0x8] sm:$0xff] %v3085_v30   ;;  %v3759_v43 = vadd.f32 %v3758_v60, %v3698_v27  ;;  %v3515_v12 = vpop.f32.mrb[117].mxu0  ;;  %v2358_v48 = vpop.f32.mrb[85].mxu1  ;;  %v5262_v30 = vld [vmem:[#allocation13_spill] sm:$0xff] }
 0x253   : > { %3081 = vst [vmem:[%s5105_s22] sm:$0xff] %v3080_v39   ;;  %v3516_v2 = vadd.f32 %v3515_v12, %v3514_v6  ;;  %v3763_v5 = vadd.f32 %v5060_v24, %v2358_v48  ;;  %v3517_v34 = vpop.f32.mrb[118].mxu0  ;;  %v3699_v58 = vpop.f32.mrb[86].mxu1 }
 0x254   : > { %v3767_v33 = vadd.f32 %v5067_v25, %v3699_v58  ;;  %v3518_v44 = vpop.f32.mrb[119].mxu0  ;;  %v2361_v13 = vpop.f32.mrb[87].mxu1  ;;  %v2514_v60 = vadd.f32 %v3759_v43, %v5090_v45 }
 0x255   : > { %v3519_v29 = vadd.f32 %v3518_v44, %v3517_v34  ;;  %v3771_v4 = vadd.f32 %v5063_v1, %v2361_v13  ;;  %v3805_v41 = vadd.f32 %v4947_v10, %v3516_v2  ;;  %v2512_v26 = vadd.f32 %v3763_v5, %v5090_v45 }
 0x256   : > { %v2515_v46 = vadd.f32 %v3767_v33, %v5090_v45 }
 0x257   : > { %v2513_v24 = vadd.f32 %v3771_v4, %v5090_v45  ;;  %v3811_v62 = vadd.f32 %v5261_v20, %v3519_v29 }
 0x258   : > { %v3095_v32 = vpack.c.bf16 %v2515_v46, %v2514_v60 }
 0x259   : > { %v3090_v25 = vpack.c.bf16 %v2513_v24, %v2512_v26  ;;  %v3520_v51 = vpop.f32.mrb[120].mxu0  ;;  %v3702_v40 = vpop.f32.mrb[88].mxu1 }
 0x25a   : > { %3159 = vst [vmem:[%s5105_s22 + $0x18] sm:$0xff] %v3095_v32   ;;  %v3775_v38 = vadd.f32 %v5075_v16, %v3702_v40  ;;  %v3521_v1 = vpop.f32.mrb[121].mxu0  ;;  %v2374_v49 = vpop.f32.mrb[89].mxu1 }
 0x25b   : > { %3158 = vst [vmem:[%s5105_s22 + $0x10] sm:$0xff] %v3090_v25   ;;  %v3522_v10 = vadd.f32 %v3521_v1, %v3520_v51  ;;  %v3779_v23 = vadd.f32 %v5070_v59, %v2374_v49  ;;  %v3523_v7 = vpop.f32.mrb[122].mxu0  ;;  %v3703_v9 = vpop.f32.mrb[90].mxu1 }
 0x25c   : > { %v3783_v3 = vadd.f32 %v5078_v18, %v3703_v9  ;;  %v3524_v21 = vpop.f32.mrb[123].mxu0  ;;  %v2377_v14 = vpop.f32.mrb[91].mxu1  ;;  %v2518_v16 = vadd.f32 %v3775_v38, %v5090_v45 }
 0x25d   : > { %v3525_v61 = vadd.f32 %v3524_v21, %v3523_v7  ;;  %v3787_v15 = vadd.f32 %v5072_v57, %v2377_v14  ;;  %v5125_v52 = vadd.f32 %v4955_v31, %v3522_v10  ;;  %v2516_v59 = vadd.f32 %v3779_v23, %v5090_v45 }
 0x25e   : > { %v2519_v22 = vadd.f32 %v3783_v3, %v5090_v45 }
 0x25f   : > { %v2517_v63 = vadd.f32 %v3787_v15, %v5090_v45  ;;  %v5132_v39 = vadd.f32 %v5262_v30, %v3525_v61 }
 0x260   : > { %v3105_v18 = vpack.c.bf16 %v2519_v22, %v2518_v16 }
 0x261   : > { %v3100_v6 = vpack.c.bf16 %v2517_v63, %v2516_v59  ;;  %v3526_v27 = vpop.f32.mrb[124].mxu0  ;;  %v3706_v43 = vpop.f32.mrb[92].mxu1 }
 0x262   : > { %3161 = vst [vmem:[%s5105_s22 + $0x28] sm:$0xff] %v3105_v18   ;;  %v3791_v57 = vadd.f32 %v5085_v50, %v3706_v43  ;;  %v3527_v31 = vpop.f32.mrb[125].mxu0  ;;  %v2390_v12 = vpop.f32.mrb[93].mxu1 }
 0x263   : > { %3160 = vst [vmem:[%s5105_s22 + $0x20] sm:$0xff] %v3100_v6   ;;  %v3528_v48 = vadd.f32 %v3527_v31, %v3526_v27  ;;  %v3795_v2 = vadd.f32 %v5080_v17, %v2390_v12  ;;  %v3529_v5 = vpop.f32.mrb[126].mxu0  ;;  %v3707_v34 = vpop.f32.mrb[94].mxu1 }
 0x264   : > { %v3799_v58 = vadd.f32 %v5088_v0, %v3707_v34  ;;  %v3530_v33 = vpop.f32.mrb[127].mxu0  ;;  %v2393_v44 = vpop.f32.mrb[95].mxu1  ;;  %v2522_v50 = vadd.f32 %v3791_v57, %v5090_v45 }
 0x265   : > { %v3531_v13 = vadd.f32 %v3530_v33, %v3529_v5  ;;  %v3803_v29 = vadd.f32 %v5082_v28, %v2393_v44  ;;  %v3817_v4 = vadd.f32 %v4963_v42, %v3528_v48  ;;  %v2520_v46 = vadd.f32 %v3795_v2, %v5090_v45 }
 0x266   : > { %v2523_v60 = vadd.f32 %v3799_v58, %v5090_v45 }
 0x267   : > { %v2521_v17 = vadd.f32 %v3803_v29, %v5090_v45  ;;  %v3823_v26 = vadd.f32 %v4967_v11, %v3531_v13 }
 0x268   : > { %v3115_v24 = vpack.c.bf16 %v2523_v60, %v2522_v50 }
 0x269   : > { %v3110_v0 = vpack.c.bf16 %v2521_v17, %v2520_v46  ;;  %v3532_v20 = vpop.f32.mrb[128].mxu0  ;;  %v3710_v32 = vpop.f32.mrb[0].mxu1 }
 0x26a   : > { %3163 = vst [vmem:[%s5105_s22 + $0x38] sm:$0xff] %v3115_v24   ;;  %v3806_v25 = vadd.f32 %v3805_v41, %v3710_v32  ;;  %v3533_v51 = vpop.f32.mrb[129].mxu0  ;;  %v2406_v28 = vpop.f32.mrb[1].mxu1 }
 0x26b   : > { %3162 = vst [vmem:[%s5105_s22 + $0x30] sm:$0xff] %v3110_v0   ;;  %v3534_v42 = vadd.f32 %v3533_v51, %v3532_v20  ;;  %v3809_v40 = vadd.f32 %v5096_v19, %v2406_v28  ;;  %v3535_v38 = vpop.f32.mrb[130].mxu0  ;;  %v3711_v1 = vpop.f32.mrb[2].mxu1 }
 0x26c   : > { %v3812_v49 = vadd.f32 %v3811_v62, %v3711_v1  ;;  %v3536_v10 = vpop.f32.mrb[131].mxu0  ;;  %v2409_v23 = vpop.f32.mrb[3].mxu1  ;;  %v2526_v41 = vadd.f32 %v3806_v25, %v5090_v45 }
 0x26d   : > { %v3537_v7 = vadd.f32 %v3536_v10, %v3535_v38  ;;  %v3815_v11 = vadd.f32 %v5103_v36, %v2409_v23  ;;  %v3832_v9 = vadd.f32 %v4979_v47, %v3534_v42  ;;  %v2524_v21 = vadd.f32 %v3809_v40, %v5090_v45 }
 0x26e   : > { %v2527_v3 = vadd.f32 %v3812_v49, %v5090_v45 }
 0x26f   : > { %v2525_v19 = vadd.f32 %v3815_v11, %v5090_v45  ;;  %v3838_v14 = vadd.f32 %v4989_v8, %v3537_v7 }
 0x270   : > { %v3125_v61 = vpack.c.bf16 %v2527_v3, %v2526_v41 }
 0x271   : > { %v3120_v62 = vpack.c.bf16 %v2525_v19, %v2524_v21  ;;  %v3538_v15 = vpop.f32.mrb[132].mxu0  ;;  %v3714_v16 = vpop.f32.mrb[4].mxu1 }
 0x272   : > { %3165 = vst [vmem:[%s5105_s22 + $0x48] sm:$0xff] %v3125_v61   ;;  %v3818_v22 = vadd.f32 %v3817_v4, %v3714_v16  ;;  %v3539_v59 = vpop.f32.mrb[133].mxu0  ;;  %v2422_v36 = vpop.f32.mrb[5].mxu1 }
 0x273   : > { %3164 = vst [vmem:[%s5105_s22 + $0x40] sm:$0xff] %v3120_v62   ;;  %v3540_v47 = vadd.f32 %v3539_v59, %v3538_v15  ;;  %v3821_v63 = vadd.f32 %v5125_v52, %v2422_v36  ;;  %v3541_v30 = vpop.f32.mrb[134].mxu0  ;;  %v3715_v18 = vpop.f32.mrb[6].mxu1 }
 0x274   : > { %v3824_v6 = vadd.f32 %v3823_v26, %v3715_v18  ;;  %v3542_v27 = vpop.f32.mrb[135].mxu0  ;;  %v2425_v43 = vpop.f32.mrb[7].mxu1  ;;  %v2530_v12 = vadd.f32 %v3818_v22, %v5090_v45 }
 0x275   : > { %v3543_v57 = vadd.f32 %v3542_v27, %v3541_v30  ;;  %v3827_v8 = vadd.f32 %v5132_v39, %v2425_v43  ;;  %v3829_v31 = vadd.f32 %v5001_v54, %v3540_v47  ;;  %v2528_v2 = vadd.f32 %v3821_v63, %v5090_v45 }
 0x276   : > { %v2531_v48 = vadd.f32 %v3824_v6, %v5090_v45 }
 0x277   : > { %v2529_v52 = vadd.f32 %v3827_v8, %v5090_v45  ;;  %v3835_v5 = vadd.f32 %v5011_v35, %v3543_v57 }
 0x278   : > { %v3135_v34 = vpack.c.bf16 %v2531_v48, %v2530_v12 }
 0x279   : > { %v3130_v58 = vpack.c.bf16 %v2529_v52, %v2528_v2  ;;  %v3544_v33 = vpop.f32.mrb[136].mxu0  ;;  %v3718_v44 = vpop.f32.mrb[8].mxu1 }
 0x27a   : > { %3167 = vst [vmem:[%s5105_s22 + $0x58] sm:$0xff] %v3135_v34   ;;  %v3830_v13 = vadd.f32 %v3829_v31, %v3718_v44  ;;  %v3545_v29 = vpop.f32.mrb[137].mxu0  ;;  %v2438_v39 = vpop.f32.mrb[9].mxu1 }
 0x27b   : > { %3166 = vst [vmem:[%s5105_s22 + $0x50] sm:$0xff] %v3130_v58   ;;  %v3546_v54 = vadd.f32 %v3545_v29, %v3544_v33  ;;  %v3833_v4 = vadd.f32 %v3832_v9, %v2438_v39  ;;  %v3547_v50 = vpop.f32.mrb[138].mxu0  ;;  %v3719_v60 = vpop.f32.mrb[10].mxu1 }
 0x27c   : > { %v3836_v46 = vadd.f32 %v3835_v5, %v3719_v60  ;;  %v3548_v17 = vpop.f32.mrb[139].mxu0  ;;  %v2441_v26 = vpop.f32.mrb[11].mxu1  ;;  %v2534_v20 = vadd.f32 %v3830_v13, %v5090_v45 }
 0x27d   : > { %v3549_v24 = vadd.f32 %v3548_v17, %v3547_v50  ;;  %v3839_v35 = vadd.f32 %v3838_v14, %v2441_v26  ;;  %v3844_v0 = vadd.f32 %v5023_v53, %v3546_v54  ;;  %v2532_v25 = vadd.f32 %v3833_v4, %v5090_v45 }
 0x27e   : > { %v2535_v32 = vadd.f32 %v3836_v46, %v5090_v45 }
 0x27f   : > { %v2533_v51 = vadd.f32 %v3839_v35, %v5090_v45  ;;  %v3850_v28 = vadd.f32 %v5031_v55, %v3549_v24 }
 0x280   : > { %v3145_v42 = vpack.c.bf16 %v2535_v32, %v2534_v20 }
 0x281   : > { %v3140_v40 = vpack.c.bf16 %v2533_v51, %v2532_v25  ;;  %v3550_v38 = vpop.f32.mrb[140].mxu0  ;;  %v3722_v1 = vpop.f32.mrb[12].mxu1 }
 0x282   : > { %3169 = vst [vmem:[%s5105_s22 + $0x68] sm:$0xff] %v3145_v42   ;;  %v3551_v49 = vpop.f32.mrb[141].mxu0  ;;  %v2454_v10 = vpop.f32.mrb[13].mxu1 }
 0x283   : > { %3168 = vst [vmem:[%s5105_s22 + $0x60] sm:$0xff] %v3140_v40   ;;  %v3552_v53 = vadd.f32 %v3551_v49, %v3550_v38  ;;  %v3845_v23 = vadd.f32 %v3844_v0, %v2454_v10  ;;  %v3553_v7 = vpop.f32.mrb[142].mxu0  ;;  %v3723_v11 = vpop.f32.mrb[14].mxu1 }
 0x284   : > { %v3554_v9 = vpop.f32.mrb[143].mxu0  ;;  %v2457_v41 = vpop.f32.mrb[15].mxu1 }
 0x285   : > { %v3841_v3 = vadd.f32 %v5041_v37, %v3552_v53  ;;  %v3555_v55 = vadd.f32 %v3554_v9, %v3553_v7  ;;  %v3851_v21 = vadd.f32 %v3850_v28, %v2457_v41  ;;  %v2536_v14 = vadd.f32 %v3845_v23, %v5090_v45 }
 0x287   : > { %v3842_v19 = vadd.f32 %v3841_v3, %v3722_v1  ;;  %v3847_v61 = vadd.f32 %v5049_v56, %v3555_v55  ;;  %v2537_v62 = vadd.f32 %v3851_v21, %v5090_v45 }
 0x289   : > { %v3848_v15 = vadd.f32 %v3847_v61, %v3723_v11  ;;  %v3150_v16 = vpack.c.bf16 %v2537_v62, %v2536_v14  ;;  %v2538_v22 = vadd.f32 %v3842_v19, %v5090_v45 }
 0x28b   : > { %v2539_v37 = vadd.f32 %v3848_v15, %v5090_v45  ;;  %3170 = vst [vmem:[%s5105_s22 + $0x70] sm:$0xff] %v3150_v16  }
 0x28d   : > { %v3155_v56 = vpack.c.bf16 %v2539_v37, %v2538_v22 }
 0x28f   : > { %3171 = vst [vmem:[%s5105_s22 + $0x78] sm:$0xff] %v3155_v56  }
 0x290   : > { %4257 = shalt.err (!%p4254_p5)
}
 0x291   : > { %s4258_s10 = scalar_lea.hbm %s5188_s9, 2048  ;;  %s4262_s29 = scalar_lea.hbm %s5242_s3, 16384 }
 0x292   : > { %p4259_p9 = scmp.ne.s32.totalorder %s5188_s9, %s4258_s10  ;;  %p4263_p3 = scmp.lt.u32.totalorder %s5188_s9, %s5242_s3 }
 0x293   : > { %p4264_p7 = scmp.lt.u32.totalorder %s4262_s29, %s4258_s10  ;;  %p4266_p1 = scmp.lt.u32.totalorder %s4258_s10, %s5188_s9 }
 0x294   : > { %p4260_p12 = pnand %p4259_p9, %p4488_p8 }
 0x295   : > { %p4265_p10 = por %p4264_p7, %p4263_p3 }
 0x296   : > { %p4261_p11 = pneg %p4260_p12 }
 0x297   : > { %p4267_p2 = por %p4266_p1, %p4265_p10 }
 0x299   : > { %p4268_p4 = pnand %p4267_p2, %p4261_p11 }
 0x29b   : > { %4271 = shalt.err (!%p4268_p4)
}
 0x29c   : > { %s4340_s22 = smov 64   ;;  %s4341_s24 = smov 4  }
 0x29d   : > { %3913 = dma.vmem_to_hbm [thread:$0]  (%p4488_p8), %s5190_s30, 2048, %s5188_s9, %s2701_s28, %s4340_s22, %s4340_s22, %s4341_s24  }
 0x29e PF: > { %p3935_p6 = scmp.ge.s32.totalorder %s4330_s17, 2  ;;  %s2730_s7 = sand.u32 1, %s4310_s12  }
 0x29f   : > { %p5263_p13 = scmp.ne.s32.totalorder %s5250_s23, 0  ;;  %s2731_s26 = scalar_lea.sflag [#allocation4], %s2730_s7 }
 0x2a1   : > { %p3927_p0 = pnand %p3935_p6, %p5263_p13 }
 0x2a3   : > { %4305 = dma.done.wait (!%p3927_p0), %s2731_s26, 2048  }
 0x2a4   : > { %4307 = vsyncadd (!%p3927_p0), %s2731_s26, 4294965248  ;;  %s20_s17 = sadd.s32 1, %s4330_s17   ;;  %s5264_s12 = smov %s4314_s13 }
 0x2a5   : > { %p17_p5 = scmp.ge.s32.totalorder %s20_s17, 10   ;;  %s5265_s13 = smov %s4318_s14 }
 0x2a6   : > { %s5266_s14 = smov %s4500_s4  ;;  %s5267_s15 = smov %s4326_s16 }
 0x2a7   : > { %s5268_s16 = smov %s5270_s18  ;;  %19 = sbr.rel (!%p17_p5) target bundleno = 7 (0x7), region = 89 }
 0x2ae   :  { %2736 = vsyncpa [#allocation3], 1 }
 0x2af   :  { %2738 = vsyncpa [#allocation3 + $0x1], 1 }
 0x2b0   :  { %2739 = vsyncpa [#allocation6], 1 }
 0x2b1   :  { %2740 = vsyncpa [#allocation4], 1 }
 0x2b2   :  { %2742 = vsyncpa [#allocation4 + $0x1], 1 }

</bundles_post_ra>
